<compile_context>
chip_gen: v7x
topology: tpu7x:2x2x1
jax: 0.10.0
libtpu: 0.0.40
codegen_flags: <defaults>
</compile_context>

<pallas_src>
import functools

import jax
import jax.numpy as jnp
from jax import lax
from jax.experimental import pallas as pl
from jax.experimental.pallas import tpu as pltpu


def _fused_lora_conv_kernel(x_ref, w_ref, b_ref, o_ref, *, kH, kW, stride, Ho, Wq):
    """One image x one C_out tile of the fused conv.

    x_ref : (1, s*s, L, C_in)       stride-phase-decomposed flat activation slab
    w_ref : (kH*kW, C_in, TILE_CO)  folded (main + scale * up@down) weight tile
    b_ref : (1, TILE_CO)            f32 bias tile
    o_ref : (1, TILE_CO, Ho*Wq)     output tile, lane-dense on Ho*Wq
    """
    Mq = Ho * Wq
    acc = None
    for kh in range(kH):
        for kw in range(kW):
            phase = (kh % stride) * stride + (kw % stride)
            off = (kh // stride) * Wq + (kw // stride)          # static offset
            # Contiguous sublane-offset slice: no per-tap reshape / relayout.
            slab = x_ref[0, phase, pl.ds(off, Mq), :]           # (Mq, C_in), native dtype
            w_tap = w_ref[kh * kW + kw]                         # (C_in, TILE_CO)
            # Canonical (M,K)@(K,N) MXU matmul, f32 accumulation.
            part = jnp.dot(slab, w_tap, preferred_element_type=jnp.float32)
            acc = part if acc is None else acc + part
    acc = acc + b_ref[...]                                      # f32 bias, broadcast over rows
    # Single epilogue transpose -> lane-dense (TILE_CO, Mq) store.
    o_ref[0] = jnp.transpose(acc).astype(o_ref.dtype)


def _pick_co_tile(c_out):
    # Tile C_out only when it is large and 128-divisible (keeps the (8,128) BlockSpec
    # constraint satisfied when the block is not the full array); otherwise keep whole.
    if c_out <= 256:
        return c_out
    for t in (512, 256, 128):
        if c_out % t == 0:
            return t
    return c_out


def _vmem_limit_bytes():
    cap = 64 * 1024 * 1024                      # conservative fallback (v7x per-core VMEM)
    try:
        cap = int(pltpu.get_tpu_info().vmem_capacity_bytes)
    except Exception:
        pass
    return int(0.8 * cap)                       # leave headroom for Mosaic internal scratch


def lora_injected_conv2d(x, w_main, b_main, w_down, w_up, *,
                         stride=1, padding=0, scale=1.0):
    """Eval-mode forward of LoraInjectedConv2d.

    x      : (N, C_in, H, W)          NCHW (PyTorch layout)
    w_main : (C_out, C_in, kH, kW)    OIHW
    b_main : (C_out,) or None
    w_down : (r, C_in, kH, kW)
    w_up   : (C_out, r, 1, 1)
    returns (N, C_out, Ho, Wo) NCHW.
    """
    N, C_in, H, W = x.shape
    C_out, _, kH, kW = w_main.shape
    r = w_down.shape[0]
    s = int(stride)
    K = C_in * kH * kW

    Hp, Wp = H + 2 * padding, W + 2 * padding
    Ho = (Hp - kH) // s + 1
    Wo = (Wp - kW) // s + 1
    Hq = Ho + (kH - 1) // s           # per-phase rows needed (includes tap halo)
    Wq = Wo + (kW - 1) // s           # per-phase cols: compute over junk cols, slice later
    Mq = Ho * Wq

    # ---- Eval-time LoRA fold (exact; done in f32 for numerical parity). ----
    wm = w_main.reshape(C_out, K).astype(jnp.float32)
    wd = w_down.reshape(r, K).astype(jnp.float32)
    wu = w_up.reshape(C_out, r).astype(jnp.float32)
    w_eff = wm + jnp.float32(scale) * (wu @ wd)                       # (C_out, K) f32
    # (C_out, C_in, kH, kW) -> (kH*kW, C_in, C_out): canonical (K,N) per-tap operand.
    w_eff = (w_eff.reshape(C_out, C_in, kH, kW)
                  .transpose(2, 3, 1, 0)
                  .reshape(kH * kW, C_in, C_out)
                  .astype(x.dtype))          # MXU is fed the model's native dtype
    if b_main is None:
        b_main = jnp.zeros((C_out,), jnp.float32)
    bias = b_main.reshape(1, C_out).astype(jnp.float32)              # f32 end-to-end

    # ---- Activation: NCHW -> padded NHWC -> stride-phase-decomposed flat slab. ----
    x_nhwc = jnp.transpose(x, (0, 2, 3, 1))
    Hp2, Wp2 = Hq * s, Wq * s
    pad_h = max(0, Hp2 - Hp)
    pad_w = max(0, Wp2 - Wp)
    x_pad = jnp.pad(x_nhwc, ((0, 0),
                             (padding, padding + pad_h),
                             (padding, padding + pad_w),
                             (0, 0)))[:, :Hp2, :Wp2, :]
    # (N, Hq, s, Wq, s, C) -> (N, s*s, Hq, Wq, C): each phase (ph,pw) = x_pad[ph::s, pw::s].
    x_ph = (x_pad.reshape(N, Hq, s, Wq, s, C_in)
                 .transpose(0, 2, 4, 1, 3, 5)
                 .reshape(N, s * s, Hq * Wq, C_in))
    # Trailing flat padding so the last tap's contiguous Mq-row slice stays in bounds,
    # rounded to a sublane multiple.
    L = Hq * Wq + (kW - 1) // s
    L = -(-L // 8) * 8
    x_ph = jnp.pad(x_ph, ((0, 0), (0, 0), (0, L - Hq * Wq), (0, 0)))

    tile_co = _pick_co_tile(C_out)
    n_co = C_out // tile_co

    kernel = functools.partial(_fused_lora_conv_kernel,
                               kH=kH, kW=kW, stride=s, Ho=Ho, Wq=Wq)

    out_flat = pl.pallas_call(
        kernel,
        out_shape=jax.ShapeDtypeStruct((N, C_out, Mq), x.dtype),
        grid_spec=pltpu.PrefetchScalarGridSpec(
            num_scalar_prefetch=0,
            grid=(N, n_co),                              # both axes independent (parallel)
            in_specs=[
                # whole-image slab; block index constant over the inner co axis -> not re-DMA'd
                pl.BlockSpec((1, s * s, L, C_in), lambda n, c: (n, 0, 0, 0)),
                pl.BlockSpec((kH * kW, C_in, tile_co), lambda n, c: (0, 0, c)),
                pl.BlockSpec((1, tile_co), lambda n, c: (0, c)),
            ],
            out_specs=pl.BlockSpec((1, tile_co, Mq), lambda n, c: (n, c, 0)),
        ),
        compiler_params=pltpu.CompilerParams(
            dimension_semantics=("parallel", "parallel"),   # megacore over N and/or C_out
            vmem_limit_bytes=_vmem_limit_bytes()),
    )(x_ph, w_eff, bias)

    # (N, C_out, Ho*Wq) -> NCHW: minor-dim split + drop of the (kW-1)//s junk columns.
    return out_flat.reshape(N, C_out, Ho, Wq)[:, :, :, :Wo]


def _reference(x, w_main, b_main, w_down, w_up, *, stride, padding, scale):
    dn = ('NCHW', 'OIHW', 'NCHW')
    conv = lax.conv_general_dilated(
        x, w_main, (stride, stride), [(padding, padding), (padding, padding)],
        dimension_numbers=dn) + b_main[None, :, None, None]
    down = lax.conv_general_dilated(
        x, w_down, (stride, stride), [(padding, padding), (padding, padding)],
        dimension_numbers=dn)
    up = lax.conv_general_dilated(down, w_up, (1, 1), [(0, 0), (0, 0)],
                                  dimension_numbers=dn)
    return conv + scale * up


if __name__ == "__main__":
    # Small config consistent with the module: Conv2d(4 -> 8, k=3, s=1, p=1), r=4.
    N, C_in, H, W = 2, 4, 16, 16
    C_out, kH, kW = 8, 3, 3
    stride, padding = 1, 1
    r, scale = 4, 1.0

    key = jax.random.PRNGKey(0)
    k1, k2, k3, k4, k5 = jax.random.split(key, 5)

    x = jax.random.normal(k1, (N, C_in, H, W), jnp.float32)
    w_main = jax.random.normal(k2, (C_out, C_in, kH, kW), jnp.float32) * 0.1
    b_main = jax.random.normal(k3, (C_out,), jnp.float32) * 0.1
    # lora_down ~ N(0, (1/r)^2) as in the module's init.
    w_down = jax.random.normal(k4, (r, C_in, kH, kW), jnp.float32) * (1.0 / r)
    # Module inits lora_up to zeros; use small nonzero values here so the LoRA
    # path is actually exercised numerically.
    w_up = jax.random.normal(k5, (C_out, r, 1, 1), jnp.float32) * 0.05

    out = lora_injected_conv2d(x, w_main, b_main, w_down, w_up,
                               stride=stride, padding=padding, scale=scale)
    out = jax.block_until_ready(out)

    ref = _reference(x, w_main, b_main, w_down, w_up,
                     stride=stride, padding=padding, scale=scale)
    assert out.shape == (N, C_out, H, W), out.shape
    err = jnp.max(jnp.abs(out - ref))
    assert jnp.allclose(out, ref, atol=1e-4, rtol=1e-4), f"max err {err}"
    print("KERNEL_OK")
</pallas_src>

<mosaic_0001>
module attributes {stable_mosaic.version = 11 : i64} {
  func.func @_fused_lora_conv_kernel(%arg0: i32, %arg1: i32, %arg2: memref<1x1x328x4xf32, #tpu.memory_space<vmem>>, %arg3: memref<9x4x8xf32, #tpu.memory_space<vmem>>, %arg4: memref<1x8xf32, #tpu.memory_space<vmem>>, %arg5: memref<1x8x288xf32, #tpu.memory_space<vmem>>) attributes {dimension_semantics = [#tpu.dimension_semantics<parallel>, #tpu.dimension_semantics<parallel>], iteration_bounds = array<i64: 2, 1>, scalar_prefetch = 0 : i64, scratch_operands = 0 : i64, tpu.core_type = #tpu.core_type<tc>, window_params = [{transform_indices = @transform_0, window_bounds = array<i64: 1, 1, 328, 4>}, {transform_indices = @transform_1, window_bounds = array<i64: 9, 4, 8>}, {transform_indices = @transform_2, window_bounds = array<i64: 1, 8>}, {transform_indices = @transform_3, window_bounds = array<i64: 1, 8, 288>}]} {
    %c0 = arith.constant 0 : index
    %c0_0 = arith.constant 0 : index
    %c0_1 = arith.constant 0 : index
    %c0_2 = arith.constant 0 : index
    %0 = vector.load %arg2[%c0, %c0_0, %c0_1, %c0_2] : memref<1x1x328x4xf32, #tpu.memory_space<vmem>>, vector<1x1x288x4xf32>
    %1 = vector.shape_cast %0 : vector<1x1x288x4xf32> to vector<288x4xf32>
    %c0_3 = arith.constant 0 : index
    %c0_4 = arith.constant 0 : index
    %c0_5 = arith.constant 0 : index
    %2 = vector.load %arg3[%c0_3, %c0_4, %c0_5] : memref<9x4x8xf32, #tpu.memory_space<vmem>>, vector<1x4x8xf32>
    %3 = vector.shape_cast %2 : vector<1x4x8xf32> to vector<4x8xf32>
    %cst = arith.constant dense<0.000000e+00> : vector<288x8xf32>
    %4 = tpu.matmul %1, %3, %cst {dimension_numbers = #tpu.dot_dimension_numbers<[1], [0], [0], [1], [0, 0, 1, 1], [], []>} : vector<288x4xf32>, vector<4x8xf32>, vector<288x8xf32> -> vector<288x8xf32>
    %c0_6 = arith.constant 0 : index
    %c0_7 = arith.constant 0 : index
    %c1 = arith.constant 1 : index
    %c0_8 = arith.constant 0 : index
    %5 = vector.load %arg2[%c0_6, %c0_7, %c1, %c0_8] : memref<1x1x328x4xf32, #tpu.memory_space<vmem>>, vector<1x1x288x4xf32>
    %6 = vector.shape_cast %5 : vector<1x1x288x4xf32> to vector<288x4xf32>
    %c1_9 = arith.constant 1 : index
    %c0_10 = arith.constant 0 : index
    %c0_11 = arith.constant 0 : index
    %7 = vector.load %arg3[%c1_9, %c0_10, %c0_11] : memref<9x4x8xf32, #tpu.memory_space<vmem>>, vector<1x4x8xf32>
    %8 = vector.shape_cast %7 : vector<1x4x8xf32> to vector<4x8xf32>
    %cst_12 = arith.constant dense<0.000000e+00> : vector<288x8xf32>
    %9 = tpu.matmul %6, %8, %cst_12 {dimension_numbers = #tpu.dot_dimension_numbers<[1], [0], [0], [1], [0, 0, 1, 1], [], []>} : vector<288x4xf32>, vector<4x8xf32>, vector<288x8xf32> -> vector<288x8xf32>
    %10 = arith.addf %4, %9 : vector<288x8xf32>
    %c0_13 = arith.constant 0 : index
    %c0_14 = arith.constant 0 : index
    %c2 = arith.constant 2 : index
    %c0_15 = arith.constant 0 : index
    %11 = vector.load %arg2[%c0_13, %c0_14, %c2, %c0_15] : memref<1x1x328x4xf32, #tpu.memory_space<vmem>>, vector<1x1x288x4xf32>
    %12 = vector.shape_cast %11 : vector<1x1x288x4xf32> to vector<288x4xf32>
    %c2_16 = arith.constant 2 : index
    %c0_17 = arith.constant 0 : index
    %c0_18 = arith.constant 0 : index
    %13 = vector.load %arg3[%c2_16, %c0_17, %c0_18] : memref<9x4x8xf32, #tpu.memory_space<vmem>>, vector<1x4x8xf32>
    %14 = vector.shape_cast %13 : vector<1x4x8xf32> to vector<4x8xf32>
    %cst_19 = arith.constant dense<0.000000e+00> : vector<288x8xf32>
    %15 = tpu.matmul %12, %14, %cst_19 {dimension_numbers = #tpu.dot_dimension_numbers<[1], [0], [0], [1], [0, 0, 1, 1], [], []>} : vector<288x4xf32>, vector<4x8xf32>, vector<288x8xf32> -> vector<288x8xf32>
    %16 = arith.addf %10, %15 : vector<288x8xf32>
    %c0_20 = arith.constant 0 : index
    %c0_21 = arith.constant 0 : index
    %c18 = arith.constant 18 : index
    %c0_22 = arith.constant 0 : index
    %17 = vector.load %arg2[%c0_20, %c0_21, %c18, %c0_22] : memref<1x1x328x4xf32, #tpu.memory_space<vmem>>, vector<1x1x288x4xf32>
    %18 = vector.shape_cast %17 : vector<1x1x288x4xf32> to vector<288x4xf32>
    %c3 = arith.constant 3 : index
    %c0_23 = arith.constant 0 : index
    %c0_24 = arith.constant 0 : index
    %19 = vector.load %arg3[%c3, %c0_23, %c0_24] : memref<9x4x8xf32, #tpu.memory_space<vmem>>, vector<1x4x8xf32>
    %20 = vector.shape_cast %19 : vector<1x4x8xf32> to vector<4x8xf32>
    %cst_25 = arith.constant dense<0.000000e+00> : vector<288x8xf32>
    %21 = tpu.matmul %18, %20, %cst_25 {dimension_numbers = #tpu.dot_dimension_numbers<[1], [0], [0], [1], [0, 0, 1, 1], [], []>} : vector<288x4xf32>, vector<4x8xf32>, vector<288x8xf32> -> vector<288x8xf32>
    %22 = arith.addf %16, %21 : vector<288x8xf32>
    %c0_26 = arith.constant 0 : index
    %c0_27 = arith.constant 0 : index
    %c19 = arith.constant 19 : index
    %c0_28 = arith.constant 0 : index
    %23 = vector.load %arg2[%c0_26, %c0_27, %c19, %c0_28] : memref<1x1x328x4xf32, #tpu.memory_space<vmem>>, vector<1x1x288x4xf32>
    %24 = vector.shape_cast %23 : vector<1x1x288x4xf32> to vector<288x4xf32>
    %c4 = arith.constant 4 : index
    %c0_29 = arith.constant 0 : index
    %c0_30 = arith.constant 0 : index
    %25 = vector.load %arg3[%c4, %c0_29, %c0_30] : memref<9x4x8xf32, #tpu.memory_space<vmem>>, vector<1x4x8xf32>
    %26 = vector.shape_cast %25 : vector<1x4x8xf32> to vector<4x8xf32>
    %cst_31 = arith.constant dense<0.000000e+00> : vector<288x8xf32>
    %27 = tpu.matmul %24, %26, %cst_31 {dimension_numbers = #tpu.dot_dimension_numbers<[1], [0], [0], [1], [0, 0, 1, 1], [], []>} : vector<288x4xf32>, vector<4x8xf32>, vector<288x8xf32> -> vector<288x8xf32>
    %28 = arith.addf %22, %27 : vector<288x8xf32>
    %c0_32 = arith.constant 0 : index
    %c0_33 = arith.constant 0 : index
    %c20 = arith.constant 20 : index
    %c0_34 = arith.constant 0 : index
    %29 = vector.load %arg2[%c0_32, %c0_33, %c20, %c0_34] : memref<1x1x328x4xf32, #tpu.memory_space<vmem>>, vector<1x1x288x4xf32>
    %30 = vector.shape_cast %29 : vector<1x1x288x4xf32> to vector<288x4xf32>
    %c5 = arith.constant 5 : index
    %c0_35 = arith.constant 0 : index
    %c0_36 = arith.constant 0 : index
    %31 = vector.load %arg3[%c5, %c0_35, %c0_36] : memref<9x4x8xf32, #tpu.memory_space<vmem>>, vector<1x4x8xf32>
    %32 = vector.shape_cast %31 : vector<1x4x8xf32> to vector<4x8xf32>
    %cst_37 = arith.constant dense<0.000000e+00> : vector<288x8xf32>
    %33 = tpu.matmul %30, %32, %cst_37 {dimension_numbers = #tpu.dot_dimension_numbers<[1], [0], [0], [1], [0, 0, 1, 1], [], []>} : vector<288x4xf32>, vector<4x8xf32>, vector<288x8xf32> -> vector<288x8xf32>
    %34 = arith.addf %28, %33 : vector<288x8xf32>
    %c0_38 = arith.constant 0 : index
    %c0_39 = arith.constant 0 : index
    %c36 = arith.constant 36 : index
    %c0_40 = arith.constant 0 : index
    %35 = vector.load %arg2[%c0_38, %c0_39, %c36, %c0_40] : memref<1x1x328x4xf32, #tpu.memory_space<vmem>>, vector<1x1x288x4xf32>
    %36 = vector.shape_cast %35 : vector<1x1x288x4xf32> to vector<288x4xf32>
    %c6 = arith.constant 6 : index
    %c0_41 = arith.constant 0 : index
    %c0_42 = arith.constant 0 : index
    %37 = vector.load %arg3[%c6, %c0_41, %c0_42] : memref<9x4x8xf32, #tpu.memory_space<vmem>>, vector<1x4x8xf32>
    %38 = vector.shape_cast %37 : vector<1x4x8xf32> to vector<4x8xf32>
    %cst_43 = arith.constant dense<0.000000e+00> : vector<288x8xf32>
    %39 = tpu.matmul %36, %38, %cst_43 {dimension_numbers = #tpu.dot_dimension_numbers<[1], [0], [0], [1], [0, 0, 1, 1], [], []>} : vector<288x4xf32>, vector<4x8xf32>, vector<288x8xf32> -> vector<288x8xf32>
    %40 = arith.addf %34, %39 : vector<288x8xf32>
    %c0_44 = arith.constant 0 : index
    %c0_45 = arith.constant 0 : index
    %c37 = arith.constant 37 : index
    %c0_46 = arith.constant 0 : index
    %41 = vector.load %arg2[%c0_44, %c0_45, %c37, %c0_46] : memref<1x1x328x4xf32, #tpu.memory_space<vmem>>, vector<1x1x288x4xf32>
    %42 = vector.shape_cast %41 : vector<1x1x288x4xf32> to vector<288x4xf32>
    %c7 = arith.constant 7 : index
    %c0_47 = arith.constant 0 : index
    %c0_48 = arith.constant 0 : index
    %43 = vector.load %arg3[%c7, %c0_47, %c0_48] : memref<9x4x8xf32, #tpu.memory_space<vmem>>, vector<1x4x8xf32>
    %44 = vector.shape_cast %43 : vector<1x4x8xf32> to vector<4x8xf32>
    %cst_49 = arith.constant dense<0.000000e+00> : vector<288x8xf32>
    %45 = tpu.matmul %42, %44, %cst_49 {dimension_numbers = #tpu.dot_dimension_numbers<[1], [0], [0], [1], [0, 0, 1, 1], [], []>} : vector<288x4xf32>, vector<4x8xf32>, vector<288x8xf32> -> vector<288x8xf32>
    %46 = arith.addf %40, %45 : vector<288x8xf32>
    %c0_50 = arith.constant 0 : index
    %c0_51 = arith.constant 0 : index
    %c38 = arith.constant 38 : index
    %c0_52 = arith.constant 0 : index
    %47 = vector.load %arg2[%c0_50, %c0_51, %c38, %c0_52] : memref<1x1x328x4xf32, #tpu.memory_space<vmem>>, vector<1x1x288x4xf32>
    %48 = vector.shape_cast %47 : vector<1x1x288x4xf32> to vector<288x4xf32>
    %c8 = arith.constant 8 : index
    %c0_53 = arith.constant 0 : index
    %c0_54 = arith.constant 0 : index
    %49 = vector.load %arg3[%c8, %c0_53, %c0_54] : memref<9x4x8xf32, #tpu.memory_space<vmem>>, vector<1x4x8xf32>
    %50 = vector.shape_cast %49 : vector<1x4x8xf32> to vector<4x8xf32>
    %cst_55 = arith.constant dense<0.000000e+00> : vector<288x8xf32>
    %51 = tpu.matmul %48, %50, %cst_55 {dimension_numbers = #tpu.dot_dimension_numbers<[1], [0], [0], [1], [0, 0, 1, 1], [], []>} : vector<288x4xf32>, vector<4x8xf32>, vector<288x8xf32> -> vector<288x8xf32>
    %52 = arith.addf %46, %51 : vector<288x8xf32>
    %c0_56 = arith.constant 0 : index
    %c0_57 = arith.constant 0 : index
    %53 = vector.load %arg4[%c0_56, %c0_57] : memref<1x8xf32, #tpu.memory_space<vmem>>, vector<1x8xf32>
    %54 = vector.broadcast %53 : vector<1x8xf32> to vector<288x8xf32>
    %55 = arith.addf %52, %54 : vector<288x8xf32>
    %56 = tpu.transpose %55, [1, 0] : vector<288x8xf32> -> vector<8x288xf32>
    %c0_58 = arith.constant 0 : index
    %c0_59 = arith.constant 0 : index
    %c0_60 = arith.constant 0 : index
    %57 = vector.load %arg5[%c0_58, %c0_59, %c0_60] : memref<1x8x288xf32, #tpu.memory_space<vmem>>, vector<1x8x288xf32>
    %58 = vector.shape_cast %57 : vector<1x8x288xf32> to vector<8x288xf32>
    %59 = vector.shape_cast %56 : vector<8x288xf32> to vector<1x8x288xf32>
    tpu.vector_store %arg5[%c0_58, %c0_59, %c0_60], %59 {strides = array<i32>} : memref<1x8x288xf32, #tpu.memory_space<vmem>>, vector<1x8x288xf32>,
    return
  }
  func.func @transform_0(%arg0: i32, %arg1: i32) -> (i32, i32, i32, i32) {
    %c0_i32 = arith.constant 0 : i32
    %c0_i32_0 = arith.constant 0 : i32
    %c0_i32_1 = arith.constant 0 : i32
    %c0_i32_2 = arith.constant 0 : i32
    return %arg0, %c0_i32, %c0_i32_0, %c0_i32_1 : i32, i32, i32, i32
  }
  func.func @transform_1(%arg0: i32, %arg1: i32) -> (i32, i32, i32) {
    %c0_i32 = arith.constant 0 : i32
    %c0_i32_0 = arith.constant 0 : i32
    %c0_i32_1 = arith.constant 0 : i32
    return %c0_i32, %c0_i32_0, %arg1 : i32, i32, i32
  }
  func.func @transform_2(%arg0: i32, %arg1: i32) -> (i32, i32) {
    %c0_i32 = arith.constant 0 : i32
    %c0_i32_0 = arith.constant 0 : i32
    return %c0_i32, %arg1 : i32, i32
  }
  func.func @transform_3(%arg0: i32, %arg1: i32) -> (i32, i32, i32) {
    %c0_i32 = arith.constant 0 : i32
    %c0_i32_0 = arith.constant 0 : i32
    return %arg0, %arg1, %c0_i32 : i32, i32, i32
  }
}

</mosaic_0001>

<bundles_post_ra>
// kernel: tpu_custom_call.1
= control target key start
LH: loop header
LB: loop body
LE: loop exit
PB: predicated region body
PF: predicated region fallthrough
CT: control target
= control target key end

     0   :  { %8 = vsyncpa [#allocation3], 0  ;;  %s6999_s0 = inlined_call_operand.vmem [shape: f32[2,1,328,4], index: 0, kind: input, shape index: {}]   ;;  %s7000_s1 = inlined_call_operand.vmem [shape: f32[9,4,8], index: 1, kind: input, shape index: {}]   ;;  %s7001_s2 = inlined_call_operand.vmem [shape: f32[1,8], index: 2, kind: input, shape index: {}]   ;;  %s7002_s3 = inlined_call_operand.hbm [shape: f32[2,8,288], index: 3, kind: output, shape index: {}]  }
   0x1   :  { %10 = vsyncpa [#allocation3 + $0x1], 0  ;;  %s5910_s12 = smov 0   ;;  %s5912_s13 = smov 0  }
   0x2   :  { %s5914_s14 = smov 0   ;;  %s5916_s15 = smov 0  }
   0x3   :  { %s5918_s16 = smov 0   ;;  %s5920_s17 = smov 0  }
   0x4 LB: > { %s4270_s18 = sadd.s32 4294967295, %s5887_s17   ;;  %s4271_s19 = sadd.s32 4294967294, %s5887_s17   ;;  %s5887_s17 = sphi %s5920_s17, %s16_s17   ;;  %s5883_s16 = sphi %s5918_s16, %s7009_s16   ;;  %s5879_s15 = sphi %s5916_s15, %s7008_s15   ;;  %s5875_s14 = sphi %s5914_s14, %s7007_s14   ;;  %s5871_s13 = sphi %s5912_s13, %s7006_s13   ;;  %s5867_s12 = sphi %s5910_s12, %s7005_s12  }
   0x5   : > { %s28_s20 = sadd.s32 1, %s5883_s16  ;;  %s115_s21 = sadd.s32 1, %s5875_s14 }
   0x6   : > { %p30_p0 = scmp.ge.s32.totalorder %s28_s20, 2  ;;  %p125_p1 = scmp.ne.s32.totalorder %s5875_s14, %s5871_s13 }
   0x7   : > { %p126_p2 = scmp.eq.s32.totalorder %s4270_s18, 1  ;;  %p131_p3 = scmp.ne.s32.totalorder %s5871_s13, %s5867_s12 }
   0x8   : > { %s7011_s20 = smov (%p30_p0, %s28_s20), 0  ;;  %p132_p5 = scmp.eq.s32.totalorder %s4271_s19, 1 }
   0x9   : > { %p5950_p4 = por %p126_p2, %p125_p1  ;;  %s110_s23 = ssub.s32 %s5883_s16, %s7011_s20 }
   0xa   : > { %p4276_p6 = scmp.ge.s32.totalorder %s5887_s17, 1  ;;  %p113_p7 = scmp.eq.s32.totalorder %s110_s23, 0 }
   0xb   : > { %p5957_p8 = por %p132_p5, %p131_p3  ;;  %p171_p9 = scmp.lt.s32.totalorder %s5887_s17, 3 }
   0xc   : > { %s5963_s25 = scalar_select %p113_p7, %s5875_s14, %s115_s21  }
   0xd   : > { %p172_p10 = pnand %p4276_p6, %p171_p9 }
   0xe   : > { %v4278_v0 = vld [vmem:[%s7000_s1 + $0x4] sm:$0xf] (!%p172_p10)  ;;  %vm398_vm0 = vcmask (!%p172_p10), 1043456   ;;  %v5971_v1 = vld [vmem:[%s7000_s1 + $0x10] sm:$0xf] (!%p172_p10)  ;;  %p202_p11 = scmp.lt.s32.totalorder (!%p172_p10), %s5879_s15, 1 }
   0xf   : > { %175 = sbr.rel (%p172_p10) target bundleno = 705 (0x2c1), region = 32  ;;  %4956 = vmatprep.subr.msk.mxu1 (!%p172_p10), %vm398_vm0, %v4278_v0  ;;  %5180 = vmatprep.subr.msk.mxu0 (!%p172_p10), %vm398_vm0, %v5971_v1  ;;  %v250_v2 = vld [vmem:[%s7000_s1] sm:$0xf] (!%p172_p10)  ;;  %v4467_v3 = vld [vmem:[%s7000_s1 + $0x14] sm:$0xf] (!%p172_p10)  ;;  %vm289_vm1 = vcmask (!%p172_p10), 31744  }
  0x10   : > { %4957 = vmatpush3.msk.msra.mxu1 (!%p172_p10), %vm398_vm0, %v4278_v0  ;;  %5181 = vmatpush3.msk.msra.mxu0 (!%p172_p10), %vm398_vm0, %v5971_v1  ;;  %v6007_v10 = vld [vmem:[%s7000_s1 + $0x18] sm:$0xf] (!%p172_p10)  ;;  %v6012_v11 = vld [vmem:[%s7000_s1 + $0x8] sm:$0xf] (!%p172_p10)  ;;  %v6095_v48 = vld [vmem:[%s7000_s1 + $0x1c] sm:$0xf] (!%p172_p10) }
  0x11   : > { %5012 = vmatprep.subr.msk.mxu1 (!%p172_p10), %vm398_vm0, %v250_v2  ;;  %5236 = vmatprep.subr.msk.mxu0 (!%p172_p10), %vm398_vm0, %v4467_v3  ;;  %s5752_s10 = smul.u32 (!%p172_p10), 384, %s5879_s15  ;;  %vm4154_vm2 = vcmask (!%p172_p10), 261120  }
  0x13   : > { %s6952_s21 = scalar_lea.hbm (!%p172_p10), %s7002_s3, %s5752_s10 }
  0x16   : > { %s203_s7 = scalar_select %p202_p11, %s5879_s15, 1 }
  0x17   : > { %s5889_s15 = smov [#allocation2]  }
  0x18   : > { %s5751_s8 = smul.u32 328, %s203_s7  ;;  %s199_s7 = sand.u32 1, %s5871_s13  }
  0x19   : > { %s4157_s23 = scalar_lea.sflag [#allocation3], %s199_s7  ;;  %s5813_s27 = sshll.u32 %s5889_s15, 4  ;;  %s5814_s27 = int_to_ptr.vmem [resolvable:$false] %s5813_s27 }
  0x1a   : > { %s5992_s11 = scalar_lea.vmem %s6999_s0, %s5751_s8  ;;  %s5750_s8 = smul.u32 24, %s199_s7 }
  0x1b   : > { %v251_v4 = vld [vmem:[%s5992_s11 + $0x1] sm:$0xff]  ;;  %v1863_v5 = vld [vmem:[%s5992_s11 + $0x13] sm:$0xff]  ;;  %v252_v6 = vld [vmem:[%s5992_s11 + $0x9] sm:$0xff]  ;;  %s5815_s28 = scalar_lea.vmem %s5814_s27, 768 }
  0x1c   : > { %4958 = vmatprep.mubr.msk.f32.mxu1 %vm289_vm1, %v251_v4  ;;  %5182 = vmatprep.mubr.msk.f32.mxu0 %vm289_vm1, %v1863_v5  ;;  %v1864_v7 = vld [vmem:[%s5992_s11 + $0x1b] sm:$0xff]  ;;  %v253_v8 = vld [vmem:[%s5992_s11 + $0x11] sm:$0xff]  ;;  %v1865_v9 = vld [vmem:[%s5992_s11 + $0x23] sm:$0xff]  ;;  %s201_s9 = scalar_lea.vmem [#allocation2], %s5750_s8 }
  0x1d   : > { %4959 = vmatmul.mubr.msk.f32.vlgmr.msra.gmra.mrb[0].mxu1 %vm289_vm1, %v252_v6  ;;  %5183 = vmatmul.mubr.msk.f32.vlgmr.msra.gmra.mrb[0].mxu0 %vm289_vm1, %v1864_v7  ;;  %v254_v12 = vld [vmem:[%s5992_s11 + $0x19] sm:$0xff]  ;;  %v1866_v13 = vld [vmem:[%s5992_s11 + $0x2b] sm:$0xff]  ;;  %v255_v14 = vld [vmem:[%s5992_s11 + $0x21] sm:$0xff] }
  0x1e   : > { %5013 = vmatpush3.msk.msra.mxu1 %vm398_vm0, %v250_v2  ;;  %5237 = vmatpush3.msk.msra.mxu0 %vm398_vm0, %v4467_v3  ;;  %v1867_v15 = vld [vmem:[%s5992_s11 + $0x33] sm:$0xff]  ;;  %v256_v16 = vld [vmem:[%s5992_s11 + $0x29] sm:$0xff]  ;;  %v1868_v17 = vld [vmem:[%s5992_s11 + $0x3b] sm:$0xff] }
  0x1f   : > { %4961 = vmatprep.mubr.msk.f32.mxu1 %vm289_vm1, %v253_v8  ;;  %5185 = vmatprep.mubr.msk.f32.mxu0 %vm289_vm1, %v1865_v9  ;;  %v257_v18 = vld [vmem:[%s5992_s11 + $0x31] sm:$0xff]  ;;  %v1869_v19 = vld [vmem:[%s5992_s11 + $0x43] sm:$0xff]  ;;  %v258_v20 = vld [vmem:[%s5992_s11 + $0x39] sm:$0xff] }
  0x20   : > { %5292 = vmatprep.subr.msk.mxu0 %vm398_vm0, %v6007_v10  ;;  %5068 = vmatprep.subr.msk.mxu1 %vm398_vm0, %v6012_v11  ;;  %v1870_v21 = vld [vmem:[%s5992_s11 + $0x4b] sm:$0xff]  ;;  %v259_v22 = vld [vmem:[%s5992_s11 + $0x41] sm:$0xff]  ;;  %v1871_v23 = vld [vmem:[%s5992_s11 + $0x53] sm:$0xff] }
  0x21   : > { %4962 = vmatmul.mubr.msk.f32.gmra.mrb[2].mxu1 %vm289_vm1, %v254_v12  ;;  %5186 = vmatmul.mubr.msk.f32.gmra.mrb[2].mxu0 %vm289_vm1, %v1866_v13  ;;  %v260_v24 = vld [vmem:[%s5992_s11 + $0x49] sm:$0xff]  ;;  %v1872_v25 = vld [vmem:[%s5992_s11 + $0x5b] sm:$0xff]  ;;  %v261_v26 = vld [vmem:[%s5992_s11 + $0x51] sm:$0xff] }
  0x22   : > { %4964 = vmatprep.mubr.msk.f32.mxu1 %vm289_vm1, %v255_v14  ;;  %5188 = vmatprep.mubr.msk.f32.mxu0 %vm289_vm1, %v1867_v15  ;;  %v1873_v27 = vld [vmem:[%s5992_s11 + $0x63] sm:$0xff]  ;;  %v262_v28 = vld [vmem:[%s5992_s11 + $0x59] sm:$0xff]  ;;  %v1874_v29 = vld [vmem:[%s5992_s11 + $0x6b] sm:$0xff] }
  0x23   : > { %v263_v30 = vld [vmem:[%s5992_s11 + $0x61] sm:$0xff]  ;;  %v1875_v31 = vld [vmem:[%s5992_s11 + $0x73] sm:$0xff]  ;;  %v264_v32 = vld [vmem:[%s5992_s11 + $0x69] sm:$0xff] }
  0x24   : > { %v1876_v33 = vld [vmem:[%s5992_s11 + $0x7b] sm:$0xff]  ;;  %v265_v34 = vld [vmem:[%s5992_s11 + $0x71] sm:$0xff]  ;;  %v1877_v35 = vld [vmem:[%s5992_s11 + $0x83] sm:$0xff] }
  0x25   : > { %4965 = vmatmul.mubr.msk.f32.gmra.mrb[4].mxu1 %vm289_vm1, %v256_v16  ;;  %5189 = vmatmul.mubr.msk.f32.gmra.mrb[4].mxu0 %vm289_vm1, %v1868_v17  ;;  %v266_v36 = vld [vmem:[%s5992_s11 + $0x79] sm:$0xff]  ;;  %v1878_v37 = vld [vmem:[%s5992_s11 + $0x8b] sm:$0xff]  ;;  %v267_v38 = vld [vmem:[%s5992_s11 + $0x81] sm:$0xff] }
  0x26   : > { %4967 = vmatprep.mubr.msk.f32.mxu1 %vm289_vm1, %v257_v18  ;;  %5191 = vmatprep.mubr.msk.f32.mxu0 %vm289_vm1, %v1869_v19  ;;  %v1879_v39 = vld [vmem:[%s5992_s11 + $0x93] sm:$0xff]  ;;  %v268_v40 = vld [vmem:[%s5992_s11 + $0x89] sm:$0xff]  ;;  %v1880_v41 = vld [vmem:[%s5992_s11 + $0x9b] sm:$0xff] }
  0x27   : > { %v269_v42 = vld [vmem:[%s5992_s11 + $0x91] sm:$0xff]  ;;  %v270_v44 = vld [vmem:[%s5992_s11 + $0x99] sm:$0xff]  ;;  %v271_v46 = vld [vmem:[%s5992_s11 + $0xa1] sm:$0xff] }
  0x28   : > { %v2293_v43 = vld [vmem:[%s5992_s11 + $0x14] sm:$0xff]  ;;  %v2294_v45 = vld [vmem:[%s5992_s11 + $0x1c] sm:$0xff]  ;;  %v6090_v47 = vld [vmem:[%s5992_s11 + $0x24] sm:$0xff] }
  0x29   : > { %4968 = vmatmul.mubr.msk.f32.gmra.mrb[6].mxu1 %vm289_vm1, %v258_v20  ;;  %5192 = vmatmul.mubr.msk.f32.gmra.mrb[6].mxu0 %vm289_vm1, %v1870_v21  ;;  %v272_v49 = vld [vmem:[%s5992_s11 + $0xa9] sm:$0xff]  ;;  %v273_v51 = vld [vmem:[%s5992_s11 + $0xb1] sm:$0xff]  ;;  %v274_v53 = vld [vmem:[%s5992_s11 + $0xb9] sm:$0xff] }
  0x2a   : > { %4970 = vmatprep.mubr.msk.f32.mxu1 %vm289_vm1, %v259_v22  ;;  %5194 = vmatprep.mubr.msk.f32.mxu0 %vm289_vm1, %v1871_v23  ;;  %v6104_v50 = vld [vmem:[%s5992_s11 + $0x2c] sm:$0xff]  ;;  %v6110_v52 = vld [vmem:[%s5992_s11 + $0x34] sm:$0xff]  ;;  %v6122_v54 = vld [vmem:[%s5992_s11 + $0x3c] sm:$0xff] }
  0x2b   : > { %v275_v55 = vld [vmem:[%s5992_s11 + $0xc1] sm:$0xff]  ;;  %v276_v57 = vld [vmem:[%s5992_s11 + $0xc9] sm:$0xff]  ;;  %v277_v59 = vld [vmem:[%s5992_s11 + $0xd1] sm:$0xff] }
  0x2c   : > { %v6126_v56 = vld [vmem:[%s5992_s11 + $0x44] sm:$0xff]  ;;  %v6136_v58 = vld [vmem:[%s5992_s11 + $0x4c] sm:$0xff]  ;;  %v6140_v60 = vld [vmem:[%s5992_s11 + $0x54] sm:$0xff] }
  0x2d   : > { %4971 = vmatmul.mubr.msk.f32.gmra.mrb[8].mxu1 %vm289_vm1, %v260_v24  ;;  %5195 = vmatmul.mubr.msk.f32.gmra.mrb[8].mxu0 %vm289_vm1, %v1872_v25  ;;  %v278_v61 = vld [vmem:[%s5992_s11 + $0xd9] sm:$0xff]  ;;  %v279_v63 = vld [vmem:[%s5992_s11 + $0xe1] sm:$0xff]  ;;  %v280_v2 = vld [vmem:[%s5992_s11 + $0xe9] sm:$0xff] }
  0x2e   : > { %4973 = vmatprep.mubr.msk.f32.mxu1 %vm289_vm1, %v261_v26  ;;  %5197 = vmatprep.mubr.msk.f32.mxu0 %vm289_vm1, %v1873_v27  ;;  %v6150_v62 = vld [vmem:[%s5992_s11 + $0x5c] sm:$0xff]  ;;  %v6154_v0 = vld [vmem:[%s5992_s11 + $0x64] sm:$0xff]  ;;  %v6164_v3 = vld [vmem:[%s5992_s11 + $0x6c] sm:$0xff] }
  0x2f   : > { %v281_v4 = vld [vmem:[%s5992_s11 + $0xf1] sm:$0xff]  ;;  %v282_v6 = vld [vmem:[%s5992_s11 + $0xf9] sm:$0xff]  ;;  %v283_v8 = vld [vmem:[%s5992_s11 + $0x101] sm:$0xff] }
  0x30   : > { %v6168_v5 = vld [vmem:[%s5992_s11 + $0x74] sm:$0xff]  ;;  %v6178_v7 = vld [vmem:[%s5992_s11 + $0x7c] sm:$0xff]  ;;  %v6182_v9 = vld [vmem:[%s5992_s11 + $0x84] sm:$0xff] }
  0x31   : > { %4974 = vmatmul.mubr.msk.f32.gmra.mrb[10].mxu1 %vm289_vm1, %v262_v28  ;;  %5198 = vmatmul.mubr.msk.f32.gmra.mrb[10].mxu0 %vm289_vm1, %v1874_v29  ;;  %v6192_v12 = vld [vmem:[%s5992_s11 + $0x8c] sm:$0xff]  ;;  %v6196_v14 = vld [vmem:[%s5992_s11 + $0x94] sm:$0xff]  ;;  %v6206_v16 = vld [vmem:[%s5992_s11 + $0x9c] sm:$0xff] }
  0x32   : > { %4976 = vmatprep.mubr.msk.f32.mxu1 %vm289_vm1, %v263_v30  ;;  %5200 = vmatprep.mubr.msk.f32.mxu0 %vm289_vm1, %v1875_v31  ;;  %v285_v13 = vld [vmem:[%s5992_s11 + $0x111] sm:$0xff]  ;;  %v286_v15 = vld [vmem:[%s5992_s11 + $0x119] sm:$0xff]  ;;  %v6210_v18 = vld [vmem:[%s5992_s11 + $0xa4] sm:$0xff] }
  0x33   : > { %v214_v17 = vld [vmem:[%s5992_s11] sm:$0xff]  ;;  %v215_v19 = vld [vmem:[%s5992_s11 + $0x8] sm:$0xff]  ;;  %v216_v21 = vld [vmem:[%s5992_s11 + $0x10] sm:$0xff] }
  0x34   : > { %v6220_v20 = vld [vmem:[%s5992_s11 + $0xac] sm:$0xff]  ;;  %v6224_v22 = vld [vmem:[%s5992_s11 + $0xb4] sm:$0xff]  ;;  %v6239_v25 = vld [vmem:[%s5992_s11 + $0xbc] sm:$0xff] }
  0x35   : > { %4977 = vmatmul.mubr.msk.f32.gmra.mrb[12].mxu1 %vm289_vm1, %v264_v32  ;;  %5201 = vmatmul.mubr.msk.f32.gmra.mrb[12].mxu0 %vm289_vm1, %v1876_v33  ;;  %v6229_v23 = vld [vmem:[%s7000_s1 + $0xc] sm:$0xf]  ;;  %v217_v24 = vld [vmem:[%s5992_s11 + $0x18] sm:$0xff]  ;;  %v218_v26 = vld [vmem:[%s5992_s11 + $0x20] sm:$0xff] }
  0x36   : > { %4979 = vmatprep.mubr.msk.f32.mxu1 %vm289_vm1, %v265_v34  ;;  %5203 = vmatprep.mubr.msk.f32.mxu0 %vm289_vm1, %v1877_v35  ;;  %v6245_v27 = vld [vmem:[%s5992_s11 + $0xc4] sm:$0xff]  ;;  %v6257_v28 = vld [vmem:[%s5992_s11 + $0xcc] sm:$0xff]  ;;  %v6261_v30 = vld [vmem:[%s5992_s11 + $0xd4] sm:$0xff] }
  0x37   : > { %v220_v29 = vld [vmem:[%s5992_s11 + $0x30] sm:$0xff]  ;;  %v221_v31 = vld [vmem:[%s5992_s11 + $0x38] sm:$0xff]  ;;  %v222_v33 = vld [vmem:[%s5992_s11 + $0x40] sm:$0xff] }
  0x38   : > { %v6271_v32 = vld [vmem:[%s5992_s11 + $0xdc] sm:$0xff]  ;;  %v6275_v34 = vld [vmem:[%s5992_s11 + $0xe4] sm:$0xff] }
  0x39   : > { %4980 = vmatmul.mubr.msk.f32.gmra.mrb[14].mxu1 %vm289_vm1, %v266_v36  ;;  %5204 = vmatmul.mubr.msk.f32.gmra.mrb[14].mxu0 %vm289_vm1, %v1878_v37  ;;  %v223_v35 = vld [vmem:[%s5992_s11 + $0x48] sm:$0xff]  ;;  %v224_v37 = vld [vmem:[%s5992_s11 + $0x50] sm:$0xff] }
  0x3a   : > { %4982 = vmatprep.mubr.msk.f32.mxu1 %vm289_vm1, %v267_v38  ;;  %5206 = vmatprep.mubr.msk.f32.mxu0 %vm289_vm1, %v1879_v39  ;;  %v6285_v36 = vld [vmem:[%s5992_s11 + $0xec] sm:$0xff]  ;;  %v6289_v38 = vld [vmem:[%s5992_s11 + $0xf4] sm:$0xff] }
  0x3b   : > { %v225_v39 = vld [vmem:[%s5992_s11 + $0x58] sm:$0xff] }
  0x3d   : > { %4983 = vmatmul.mubr.msk.f32.gmra.mrb[16].mxu1 %vm289_vm1, %v268_v40  ;;  %5207 = vmatmul.mubr.msk.f32.gmra.mrb[16].mxu0 %vm289_vm1, %v1880_v41  ;;  %v6299_v40 = vld [vmem:[%s5992_s11 + $0xfc] sm:$0xff] }
  0x3e   : > { %4985 = vmatprep.mubr.msk.f32.mxu1 %vm289_vm1, %v269_v42  ;;  %5238 = vmatprep.mubr.msk.f32.mxu0 %vm289_vm1, %v2293_v43  ;;  %v226_v41 = vld [vmem:[%s5992_s11 + $0x60] sm:$0xff]  ;;  %v227_v43 = vld [vmem:[%s5992_s11 + $0x68] sm:$0xff] }
  0x3f   : > { %v6303_v42 = vld [vmem:[%s5992_s11 + $0x104] sm:$0xff] }
  0x41   : > { %4986 = vmatmul.mubr.msk.f32.gmra.mrb[18].mxu1 %vm289_vm1, %v270_v44  ;;  %5239 = vmatmul.mubr.msk.f32.vlgmr.msra.gmra.mrb[0].mxu0 %vm289_vm1, %v2294_v45  ;;  %v6313_v44 = vld [vmem:[%s5992_s11 + $0x10c] sm:$0xff] }
  0x42   : > { %5293 = vmatpush3.msk.msra.mxu0 %vm398_vm0, %v6007_v10  ;;  %4988 = vmatprep.mubr.msk.f32.mxu1 %vm289_vm1, %v271_v46  ;;  %v284_v10 = vld [vmem:[%s5992_s11 + $0x109] sm:$0xff]  ;;  %v6317_v46 = vld [vmem:[%s5992_s11 + $0x114] sm:$0xff] }
  0x43   : > { %5241 = vmatprep.mubr.msk.f32.mxu0 %vm289_vm1, %v6090_v47  ;;  %5348 = vmatprep.subr.msk.mxu0 %vm398_vm0, %v6095_v48  ;;  %v228_v45 = vld [vmem:[%s5992_s11 + $0x70] sm:$0xff] }
  0x45   : > { %4989 = vmatmul.mubr.msk.f32.gmra.mrb[20].mxu1 %vm289_vm1, %v272_v49  ;;  %5242 = vmatmul.mubr.msk.f32.gmra.mrb[2].mxu0 %vm289_vm1, %v6104_v50  ;;  %v229_v49 = vld [vmem:[%s5992_s11 + $0x78] sm:$0xff] }
  0x46   : > { %4991 = vmatprep.mubr.msk.f32.mxu1 %vm289_vm1, %v273_v51  ;;  %5244 = vmatprep.mubr.msk.f32.mxu0 %vm289_vm1, %v6110_v52  ;;  %v6327_v51 = vld [vmem:[%s5992_s11 + $0x11c] sm:$0xff] }
  0x49   : > { %4992 = vmatmul.mubr.msk.f32.gmra.mrb[22].mxu1 %vm289_vm1, %v274_v53  ;;  %5245 = vmatmul.mubr.msk.f32.gmra.mrb[4].mxu0 %vm289_vm1, %v6122_v54  ;;  %v230_v53 = vld [vmem:[%s5992_s11 + $0x80] sm:$0xff] }
  0x4a   : > { %4994 = vmatprep.mubr.msk.f32.mxu1 %vm289_vm1, %v275_v55  ;;  %5247 = vmatprep.mubr.msk.f32.mxu0 %vm289_vm1, %v6126_v56  ;;  %v6331_v55 = vld [vmem:[%s5992_s11 + $0x124] sm:$0xff] }
  0x4d   : > { %4995 = vmatmul.mubr.msk.f32.gmra.mrb[24].mxu1 %vm289_vm1, %v276_v57  ;;  %5248 = vmatmul.mubr.msk.f32.gmra.mrb[6].mxu0 %vm289_vm1, %v6136_v58  ;;  %v231_v57 = vld [vmem:[%s5992_s11 + $0x88] sm:$0xff] }
  0x4e   : > { %4997 = vmatprep.mubr.msk.f32.mxu1 %vm289_vm1, %v277_v59  ;;  %5250 = vmatprep.mubr.msk.f32.mxu0 %vm289_vm1, %v6140_v60  ;;  %v6341_v59 = vld [vmem:[%s5992_s11 + $0x12c] sm:$0xff] }
  0x51   : > { %4998 = vmatmul.mubr.msk.f32.gmra.mrb[26].mxu1 %vm289_vm1, %v278_v61  ;;  %5251 = vmatmul.mubr.msk.f32.gmra.mrb[8].mxu0 %vm289_vm1, %v6150_v62  ;;  %v232_v61 = vld [vmem:[%s5992_s11 + $0x90] sm:$0xff] }
  0x52   : > { %5000 = vmatprep.mubr.msk.f32.mxu1 %vm289_vm1, %v279_v63  ;;  %5253 = vmatprep.mubr.msk.f32.mxu0 %vm289_vm1, %v6154_v0  ;;  %v233_v63 = vld [vmem:[%s5992_s11 + $0x98] sm:$0xff] }
  0x55   : > { %5001 = vmatmul.mubr.msk.f32.gmra.mrb[28].mxu1 %vm289_vm1, %v280_v2  ;;  %5254 = vmatmul.mubr.msk.f32.gmra.mrb[10].mxu0 %vm289_vm1, %v6164_v3  ;;  %v234_v2 = vld [vmem:[%s5992_s11 + $0xa0] sm:$0xff] }
  0x56   : > { %5003 = vmatprep.mubr.msk.f32.mxu1 %vm289_vm1, %v281_v4  ;;  %5256 = vmatprep.mubr.msk.f32.mxu0 %vm289_vm1, %v6168_v5  ;;  %v6355_v4 = vld [vmem:[%s7000_s1 + $0x20] sm:$0xf] }
  0x59   : > { %5004 = vmatmul.mubr.msk.f32.gmra.mrb[30].mxu1 %vm289_vm1, %v282_v6  ;;  %5257 = vmatmul.mubr.msk.f32.gmra.mrb[12].mxu0 %vm289_vm1, %v6178_v7  ;;  %v236_v6 = vld [vmem:[%s5992_s11 + $0xb0] sm:$0xff] }
  0x5a   : > { %5006 = vmatprep.mubr.msk.f32.mxu1 %vm289_vm1, %v283_v8  ;;  %5259 = vmatprep.mubr.msk.f32.mxu0 %vm289_vm1, %v6182_v9  ;;  %v249_v8 = vld [vmem:[%s5992_s11 + $0x118] sm:$0xff] }
  0x5d   : > { %5007 = vmatmul.mubr.msk.f32.gmra.mrb[32].mxu1 %vm289_vm1, %v284_v10  ;;  %5260 = vmatmul.mubr.msk.f32.gmra.mrb[14].mxu0 %vm289_vm1, %v6192_v12  ;;  %v1004_v10 = vld [vmem:[%s5992_s11 + $0xa] sm:$0xff] }
  0x5e   : > { %5009 = vmatprep.mubr.msk.f32.mxu1 %vm289_vm1, %v285_v13  ;;  %5262 = vmatprep.mubr.msk.f32.mxu0 %vm289_vm1, %v6196_v14  ;;  %v6443_v13 = vld [vmem:[%s5992_s11 + $0x1a] sm:$0xff] }
  0x61   : > { %5010 = vmatmul.mubr.msk.f32.gmra.mrb[34].mxu1 %vm289_vm1, %v286_v15  ;;  %5263 = vmatmul.mubr.msk.f32.gmra.mrb[16].mxu0 %vm289_vm1, %v6206_v16  ;;  %v6461_v15 = vld [vmem:[%s5992_s11 + $0x2a] sm:$0xff] }
  0x62   : > { %5014 = vmatprep.mubr.msk.f32.mxu1 %vm289_vm1, %v214_v17  ;;  %5265 = vmatprep.mubr.msk.f32.mxu0 %vm289_vm1, %v6210_v18  ;;  %v6475_v17 = vld [vmem:[%s5992_s11 + $0x3a] sm:$0xff] }
  0x65   : > { %5015 = vmatmul.mubr.msk.f32.vlgmr.msra.gmra.mrb[0].mxu1 %vm289_vm1, %v215_v19  ;;  %5266 = vmatmul.mubr.msk.f32.gmra.mrb[18].mxu0 %vm289_vm1, %v6220_v20  ;;  %v6489_v19 = vld [vmem:[%s5992_s11 + $0x4a] sm:$0xff] }
  0x66   : > { %5069 = vmatpush3.msk.msra.mxu1 %vm398_vm0, %v6012_v11  ;;  %5017 = vmatprep.mubr.msk.f32.mxu1 %vm289_vm1, %v216_v21  ;;  %v219_v11 = vld [vmem:[%s5992_s11 + $0x28] sm:$0xff]  ;;  %v6503_v21 = vld [vmem:[%s5992_s11 + $0x5a] sm:$0xff] }
  0x67   : > { %5268 = vmatprep.mubr.msk.f32.mxu0 %vm289_vm1, %v6224_v22  ;;  %5124 = vmatprep.subr.msk.mxu1 %vm398_vm0, %v6229_v23 }
  0x69   : > { %5018 = vmatmul.mubr.msk.f32.gmra.mrb[2].mxu1 %vm289_vm1, %v217_v24  ;;  %5269 = vmatmul.mubr.msk.f32.gmra.mrb[20].mxu0 %vm289_vm1, %v6239_v25  ;;  %v6520_v24 = vld [vmem:[%s5992_s11 + $0x72] sm:$0xff] }
  0x6a   : > { %5020 = vmatprep.mubr.msk.f32.mxu1 %vm289_vm1, %v218_v26  ;;  %5271 = vmatprep.mubr.msk.f32.mxu0 %vm289_vm1, %v6245_v27  ;;  %v6534_v26 = vld [vmem:[%s5992_s11 + $0x82] sm:$0xff] }
  0x6d   : > { %5021 = vmatmul.mubr.msk.f32.gmra.mrb[4].mxu1 %vm289_vm1, %v219_v11  ;;  %5272 = vmatmul.mubr.msk.f32.gmra.mrb[22].mxu0 %vm289_vm1, %v6257_v28  ;;  %v6545_v11 = vld [vmem:[%s5992_s11 + $0x8a] sm:$0xff] }
  0x6e   : > { %5023 = vmatprep.mubr.msk.f32.mxu1 %vm289_vm1, %v220_v29  ;;  %5274 = vmatprep.mubr.msk.f32.mxu0 %vm289_vm1, %v6261_v30  ;;  %v6549_v29 = vld [vmem:[%s5992_s11 + $0x92] sm:$0xff] }
  0x71   : > { %5024 = vmatmul.mubr.msk.f32.gmra.mrb[6].mxu1 %vm289_vm1, %v221_v31  ;;  %5275 = vmatmul.mubr.msk.f32.gmra.mrb[24].mxu0 %vm289_vm1, %v6271_v32  ;;  %v6559_v31 = vld [vmem:[%s5992_s11 + $0x9a] sm:$0xff] }
  0x72   : > { %5026 = vmatprep.mubr.msk.f32.mxu1 %vm289_vm1, %v222_v33  ;;  %5277 = vmatprep.mubr.msk.f32.mxu0 %vm289_vm1, %v6275_v34  ;;  %v6563_v33 = vld [vmem:[%s5992_s11 + $0xa2] sm:$0xff] }
  0x75   : > { %5027 = vmatmul.mubr.msk.f32.gmra.mrb[8].mxu1 %vm289_vm1, %v223_v35  ;;  %5278 = vmatmul.mubr.msk.f32.gmra.mrb[26].mxu0 %vm289_vm1, %v6285_v36  ;;  %v6574_v35 = vld [vmem:[%s5992_s11 + $0xaa] sm:$0xff] }
  0x76   : > { %5029 = vmatprep.mubr.msk.f32.mxu1 %vm289_vm1, %v224_v37  ;;  %5280 = vmatprep.mubr.msk.f32.mxu0 %vm289_vm1, %v6289_v38  ;;  %v6579_v37 = vld [vmem:[%s5992_s11 + $0xb2] sm:$0xff] }
  0x79   : > { %5030 = vmatmul.mubr.msk.f32.gmra.mrb[10].mxu1 %vm289_vm1, %v225_v39  ;;  %5281 = vmatmul.mubr.msk.f32.gmra.mrb[28].mxu0 %vm289_vm1, %v6299_v40  ;;  %v6589_v39 = vld [vmem:[%s5992_s11 + $0xba] sm:$0xff] }
  0x7a   : > { %5032 = vmatprep.mubr.msk.f32.mxu1 %vm289_vm1, %v226_v41  ;;  %5283 = vmatprep.mubr.msk.f32.mxu0 %vm289_vm1, %v6303_v42  ;;  %v6593_v41 = vld [vmem:[%s5992_s11 + $0xc2] sm:$0xff] }
  0x7d   : > { %5033 = vmatmul.mubr.msk.f32.gmra.mrb[12].mxu1 %vm289_vm1, %v227_v43  ;;  %5284 = vmatmul.mubr.msk.f32.gmra.mrb[30].mxu0 %vm289_vm1, %v6313_v44  ;;  %v6603_v43 = vld [vmem:[%s5992_s11 + $0xca] sm:$0xff] }
  0x7e   : > { %5035 = vmatprep.mubr.msk.f32.mxu1 %vm289_vm1, %v228_v45  ;;  %5286 = vmatprep.mubr.msk.f32.mxu0 %vm289_vm1, %v6317_v46  ;;  %v6607_v45 = vld [vmem:[%s5992_s11 + $0xd2] sm:$0xff] }
  0x81   : > { %5036 = vmatmul.mubr.msk.f32.gmra.mrb[14].mxu1 %vm289_vm1, %v229_v49  ;;  %5287 = vmatmul.mubr.msk.f32.gmra.mrb[32].mxu0 %vm289_vm1, %v6327_v51  ;;  %v6617_v49 = vld [vmem:[%s5992_s11 + $0xda] sm:$0xff] }
  0x82   : > { %5038 = vmatprep.mubr.msk.f32.mxu1 %vm289_vm1, %v230_v53  ;;  %5289 = vmatprep.mubr.msk.f32.mxu0 %vm289_vm1, %v6331_v55  ;;  %v6621_v53 = vld [vmem:[%s5992_s11 + $0xe2] sm:$0xff] }
  0x85   : > { %5039 = vmatmul.mubr.msk.f32.gmra.mrb[16].mxu1 %vm289_vm1, %v231_v57  ;;  %5290 = vmatmul.mubr.msk.f32.gmra.mrb[34].mxu0 %vm289_vm1, %v6341_v59  ;;  %v6631_v57 = vld [vmem:[%s5992_s11 + $0xea] sm:$0xff] }
  0x86   : > { %5041 = vmatprep.mubr.msk.f32.mxu1 %vm289_vm1, %v232_v61  ;;  %5294 = vmatprep.mubr.msk.f32.mxu0 %vm289_vm1, %v6090_v47  ;;  %v235_v47 = vld [vmem:[%s5992_s11 + $0xa8] sm:$0xff]  ;;  %v6635_v61 = vld [vmem:[%s5992_s11 + $0xf2] sm:$0xff] }
  0x89   : > { %5042 = vmatmul.mubr.msk.f32.gmra.mrb[18].mxu1 %vm289_vm1, %v233_v63  ;;  %5295 = vmatmul.mubr.msk.f32.vlgmr.msra.gmra.mrb[0].mxu0 %vm289_vm1, %v6104_v50  ;;  %v238_v50 = vld [vmem:[%s5992_s11 + $0xc0] sm:$0xff] }
  0x8a   : > { %5349 = vmatpush3.msk.msra.mxu0 %vm398_vm0, %v6095_v48  ;;  %5044 = vmatprep.mubr.msk.f32.mxu1 %vm289_vm1, %v234_v2  ;;  %v237_v48 = vld [vmem:[%s5992_s11 + $0xb8] sm:$0xff]  ;;  %v3165_v63 = vld [vmem:[%s5992_s11 + $0x85] sm:$0xff] }
  0x8b   : > { %5297 = vmatprep.mubr.msk.f32.mxu0 %vm289_vm1, %v6110_v52  ;;  %5404 = vmatprep.subr.msk.mxu0 %vm398_vm0, %v6355_v4  ;;  %v239_v52 = vld [vmem:[%s5992_s11 + $0xc8] sm:$0xff]  ;;  %v6645_v2 = vld [vmem:[%s5992_s11 + $0xfa] sm:$0xff] }
  0x8d   : > { %5045 = vmatmul.mubr.msk.f32.gmra.mrb[20].mxu1 %vm289_vm1, %v235_v47  ;;  %5298 = vmatmul.mubr.msk.f32.gmra.mrb[2].mxu0 %vm289_vm1, %v6122_v54  ;;  %v240_v54 = vld [vmem:[%s5992_s11 + $0xd0] sm:$0xff]  ;;  %v6649_v47 = vld [vmem:[%s5992_s11 + $0x102] sm:$0xff] }
  0x8e   : > { %5047 = vmatprep.mubr.msk.f32.mxu1 %vm289_vm1, %v236_v6  ;;  %5300 = vmatprep.mubr.msk.f32.mxu0 %vm289_vm1, %v6126_v56  ;;  %v241_v56 = vld [vmem:[%s5992_s11 + $0xd8] sm:$0xff] }
  0x8f   : > { %v3167_v6 = vld [vmem:[%s5992_s11 + $0x95] sm:$0xff] }
  0x91   : > { %5048 = vmatmul.mubr.msk.f32.gmra.mrb[22].mxu1 %vm289_vm1, %v237_v48  ;;  %5301 = vmatmul.mubr.msk.f32.gmra.mrb[4].mxu0 %vm289_vm1, %v6136_v58  ;;  %v242_v58 = vld [vmem:[%s5992_s11 + $0xe0] sm:$0xff]  ;;  %v6659_v48 = vld [vmem:[%s5992_s11 + $0x10a] sm:$0xff] }
  0x92   : > { %5050 = vmatprep.mubr.msk.f32.mxu1 %vm289_vm1, %v238_v50  ;;  %5303 = vmatprep.mubr.msk.f32.mxu0 %vm289_vm1, %v6140_v60  ;;  %v243_v60 = vld [vmem:[%s5992_s11 + $0xe8] sm:$0xff]  ;;  %v3168_v50 = vld [vmem:[%s5992_s11 + $0x9d] sm:$0xff] }
  0x95   : > { %5051 = vmatmul.mubr.msk.f32.gmra.mrb[24].mxu1 %vm289_vm1, %v239_v52  ;;  %5304 = vmatmul.mubr.msk.f32.gmra.mrb[6].mxu0 %vm289_vm1, %v6150_v62  ;;  %v244_v62 = vld [vmem:[%s5992_s11 + $0xf0] sm:$0xff] }
  0x96   : > { %5053 = vmatprep.mubr.msk.f32.mxu1 %vm289_vm1, %v240_v54  ;;  %5306 = vmatprep.mubr.msk.f32.mxu0 %vm289_vm1, %v6154_v0  ;;  %v245_v0 = vld [vmem:[%s5992_s11 + $0xf8] sm:$0xff]  ;;  %v3169_v54 = vld [vmem:[%s5992_s11 + $0xa5] sm:$0xff] }
  0x97   : > { %v6663_v52 = vld [vmem:[%s5992_s11 + $0x112] sm:$0xff] }
  0x99   : > { %5054 = vmatmul.mubr.msk.f32.gmra.mrb[26].mxu1 %vm289_vm1, %v241_v56  ;;  %5307 = vmatmul.mubr.msk.f32.gmra.mrb[8].mxu0 %vm289_vm1, %v6164_v3  ;;  %v246_v3 = vld [vmem:[%s5992_s11 + $0x100] sm:$0xff] }
  0x9a   : > { %5056 = vmatprep.mubr.msk.f32.mxu1 %vm289_vm1, %v242_v58  ;;  %5309 = vmatprep.mubr.msk.f32.mxu0 %vm289_vm1, %v6168_v5  ;;  %v247_v5 = vld [vmem:[%s5992_s11 + $0x108] sm:$0xff]  ;;  %v6673_v56 = vld [vmem:[%s5992_s11 + $0x11a] sm:$0xff] }
  0x9b   : > { %v3170_v58 = vld [vmem:[%s5992_s11 + $0xad] sm:$0xff] }
  0x9d   : > { %5057 = vmatmul.mubr.msk.f32.gmra.mrb[28].mxu1 %vm289_vm1, %v243_v60  ;;  %5310 = vmatmul.mubr.msk.f32.gmra.mrb[10].mxu0 %vm289_vm1, %v6178_v7  ;;  %v248_v7 = vld [vmem:[%s5992_s11 + $0x110] sm:$0xff] }
  0x9e   : > { %5059 = vmatprep.mubr.msk.f32.mxu1 %vm289_vm1, %v244_v62  ;;  %5312 = vmatprep.mubr.msk.f32.mxu0 %vm289_vm1, %v6182_v9  ;;  %v1003_v9 = vld [vmem:[%s5992_s11 + $0x2] sm:$0xff]  ;;  %v3171_v60 = vld [vmem:[%s5992_s11 + $0xb5] sm:$0xff] }
  0x9f   : > { %v3172_v62 = vld [vmem:[%s5992_s11 + $0xbd] sm:$0xff] }
  0xa1   : > { %5060 = vmatmul.mubr.msk.f32.gmra.mrb[30].mxu1 %vm289_vm1, %v245_v0  ;;  %5313 = vmatmul.mubr.msk.f32.gmra.mrb[12].mxu0 %vm289_vm1, %v6192_v12  ;;  %v6433_v12 = vld [vmem:[%s5992_s11 + $0x12] sm:$0xff]  ;;  %v3173_v0 = vld [vmem:[%s5992_s11 + $0xc5] sm:$0xff] }
  0xa2   : > { %5062 = vmatprep.mubr.msk.f32.mxu1 %vm289_vm1, %v246_v3  ;;  %5315 = vmatprep.mubr.msk.f32.mxu0 %vm289_vm1, %v6196_v14  ;;  %v6448_v14 = vld [vmem:[%s5992_s11 + $0x22] sm:$0xff]  ;;  %v3174_v3 = vld [vmem:[%s5992_s11 + $0xcd] sm:$0xff] }
  0xa5   : > { %5063 = vmatmul.mubr.msk.f32.gmra.mrb[32].mxu1 %vm289_vm1, %v247_v5  ;;  %5316 = vmatmul.mubr.msk.f32.gmra.mrb[14].mxu0 %vm289_vm1, %v6206_v16  ;;  %v6464_v16 = vld [vmem:[%s5992_s11 + $0x32] sm:$0xff] }
  0xa6   : > { %5065 = vmatprep.mubr.msk.f32.mxu1 %vm289_vm1, %v248_v7  ;;  %5318 = vmatprep.mubr.msk.f32.mxu0 %vm289_vm1, %v6210_v18  ;;  %v6478_v18 = vld [vmem:[%s5992_s11 + $0x42] sm:$0xff]  ;;  %v3175_v5 = vld [vmem:[%s5992_s11 + $0xd5] sm:$0xff] }
  0xa7   : > { %v3177_v7 = vld [vmem:[%s5992_s11 + $0xe5] sm:$0xff] }
  0xa9   : > { %5066 = vmatmul.mubr.msk.f32.gmra.mrb[34].mxu1 %vm289_vm1, %v249_v8  ;;  %5319 = vmatmul.mubr.msk.f32.gmra.mrb[16].mxu0 %vm289_vm1, %v6220_v20  ;;  %v6492_v20 = vld [vmem:[%s5992_s11 + $0x52] sm:$0xff] }
  0xaa   : > { %5070 = vmatprep.mubr.msk.f32.mxu1 %vm289_vm1, %v1003_v9  ;;  %5321 = vmatprep.mubr.msk.f32.mxu0 %vm289_vm1, %v6224_v22  ;;  %v6506_v22 = vld [vmem:[%s5992_s11 + $0x62] sm:$0xff]  ;;  %v3178_v8 = vld [vmem:[%s5992_s11 + $0xed] sm:$0xff]  ;;  %v3179_v9 = vld [vmem:[%s5992_s11 + $0xf5] sm:$0xff] }
  0xad   : > { %5071 = vmatmul.mubr.msk.f32.vlgmr.msra.gmra.mrb[0].mxu1 %vm289_vm1, %v1004_v10  ;;  %5322 = vmatmul.mubr.msk.f32.gmra.mrb[18].mxu0 %vm289_vm1, %v6239_v25  ;;  %v6531_v25 = vld [vmem:[%s5992_s11 + $0x7a] sm:$0xff] }
  0xae   : > { %5125 = vmatpush3.msk.msra.mxu1 %vm398_vm0, %v6229_v23  ;;  %5073 = vmatprep.mubr.msk.f32.mxu1 %vm289_vm1, %v6433_v12  ;;  %v6517_v23 = vld [vmem:[%s5992_s11 + $0x6a] sm:$0xff]  ;;  %v3180_v10 = vld [vmem:[%s5992_s11 + $0xfd] sm:$0xff] }
  0xaf   : > { %5324 = vmatprep.mubr.msk.f32.mxu0 %vm289_vm1, %v6245_v27  ;;  %5460 = vmatprep.subr.msk.mxu1 %vm398_vm0, %v5971_v1  ;;  %v2757_v27 = vld [vmem:[%s5992_s11 + $0x134] sm:$0xff] }
  0xb1   : > { %5074 = vmatmul.mubr.msk.f32.gmra.mrb[2].mxu1 %vm289_vm1, %v6443_v13  ;;  %5325 = vmatmul.mubr.msk.f32.gmra.mrb[20].mxu0 %vm289_vm1, %v6257_v28  ;;  %v2758_v28 = vld [vmem:[%s5992_s11 + $0x13c] sm:$0xff] }
  0xb2   : > { %5076 = vmatprep.mubr.msk.f32.mxu1 %vm289_vm1, %v6448_v14  ;;  %5327 = vmatprep.mubr.msk.f32.mxu0 %vm289_vm1, %v6261_v30  ;;  %v3153_v30 = vld [vmem:[%s5992_s11 + $0x25] sm:$0xff] }
  0xb5   : > { %5077 = vmatmul.mubr.msk.f32.gmra.mrb[4].mxu1 %vm289_vm1, %v6461_v15  ;;  %5328 = vmatmul.mubr.msk.f32.gmra.mrb[22].mxu0 %vm289_vm1, %v6271_v32  ;;  %v3154_v32 = vld [vmem:[%s5992_s11 + $0x2d] sm:$0xff] }
  0xb6   : > { %5079 = vmatprep.mubr.msk.f32.mxu1 %vm289_vm1, %v6464_v16  ;;  %5330 = vmatprep.mubr.msk.f32.mxu0 %vm289_vm1, %v6275_v34  ;;  %v3155_v34 = vld [vmem:[%s5992_s11 + $0x35] sm:$0xff] }
  0xb9   : > { %5080 = vmatmul.mubr.msk.f32.gmra.mrb[6].mxu1 %vm289_vm1, %v6475_v17  ;;  %5331 = vmatmul.mubr.msk.f32.gmra.mrb[24].mxu0 %vm289_vm1, %v6285_v36  ;;  %v3156_v36 = vld [vmem:[%s5992_s11 + $0x3d] sm:$0xff] }
  0xba   : > { %5082 = vmatprep.mubr.msk.f32.mxu1 %vm289_vm1, %v6478_v18  ;;  %5333 = vmatprep.mubr.msk.f32.mxu0 %vm289_vm1, %v6289_v38  ;;  %v3157_v38 = vld [vmem:[%s5992_s11 + $0x45] sm:$0xff] }
  0xbd   : > { %5083 = vmatmul.mubr.msk.f32.gmra.mrb[8].mxu1 %vm289_vm1, %v6489_v19  ;;  %5334 = vmatmul.mubr.msk.f32.gmra.mrb[26].mxu0 %vm289_vm1, %v6299_v40  ;;  %v3158_v40 = vld [vmem:[%s5992_s11 + $0x4d] sm:$0xff] }
  0xbe   : > { %5085 = vmatprep.mubr.msk.f32.mxu1 %vm289_vm1, %v6492_v20  ;;  %5336 = vmatprep.mubr.msk.f32.mxu0 %vm289_vm1, %v6303_v42  ;;  %v3159_v42 = vld [vmem:[%s5992_s11 + $0x55] sm:$0xff] }
  0xc1   : > { %5086 = vmatmul.mubr.msk.f32.gmra.mrb[10].mxu1 %vm289_vm1, %v6503_v21  ;;  %5337 = vmatmul.mubr.msk.f32.gmra.mrb[28].mxu0 %vm289_vm1, %v6313_v44  ;;  %v3160_v44 = vld [vmem:[%s5992_s11 + $0x5d] sm:$0xff] }
  0xc2   : > { %5088 = vmatprep.mubr.msk.f32.mxu1 %vm289_vm1, %v6506_v22  ;;  %5339 = vmatprep.mubr.msk.f32.mxu0 %vm289_vm1, %v6317_v46  ;;  %v3161_v46 = vld [vmem:[%s5992_s11 + $0x65] sm:$0xff] }
  0xc5   : > { %5089 = vmatmul.mubr.msk.f32.gmra.mrb[12].mxu1 %vm289_vm1, %v6517_v23  ;;  %5340 = vmatmul.mubr.msk.f32.gmra.mrb[30].mxu0 %vm289_vm1, %v6327_v51  ;;  %v3162_v51 = vld [vmem:[%s5992_s11 + $0x6d] sm:$0xff] }
  0xc6   : > { %5091 = vmatprep.mubr.msk.f32.mxu1 %vm289_vm1, %v6520_v24  ;;  %5342 = vmatprep.mubr.msk.f32.mxu0 %vm289_vm1, %v6331_v55  ;;  %v3163_v55 = vld [vmem:[%s5992_s11 + $0x75] sm:$0xff] }
  0xc9   : > { %5092 = vmatmul.mubr.msk.f32.gmra.mrb[14].mxu1 %vm289_vm1, %v6531_v25  ;;  %5343 = vmatmul.mubr.msk.f32.gmra.mrb[32].mxu0 %vm289_vm1, %v6341_v59  ;;  %v3164_v59 = vld [vmem:[%s5992_s11 + $0x7d] sm:$0xff] }
  0xca   : > { %5094 = vmatprep.mubr.msk.f32.mxu1 %vm289_vm1, %v6534_v26  ;;  %5345 = vmatprep.mubr.msk.f32.mxu0 %vm289_vm1, %v2757_v27  ;;  %v3590_v27 = vld [vmem:[%s5992_s11 + $0x5e] sm:$0xff] }
  0xcd   : > { %5095 = vmatmul.mubr.msk.f32.gmra.mrb[16].mxu1 %vm289_vm1, %v6545_v11  ;;  %5346 = vmatmul.mubr.msk.f32.gmra.mrb[34].mxu0 %vm289_vm1, %v2758_v28  ;;  %v3592_v28 = vld [vmem:[%s5992_s11 + $0x6e] sm:$0xff] }
  0xce   : > { %5097 = vmatprep.mubr.msk.f32.mxu1 %vm289_vm1, %v6549_v29  ;;  %5350 = vmatprep.mubr.msk.f32.mxu0 %vm289_vm1, %v3153_v30  ;;  %v3594_v30 = vld [vmem:[%s5992_s11 + $0x7e] sm:$0xff] }
  0xd1   : > { %5098 = vmatmul.mubr.msk.f32.gmra.mrb[18].mxu1 %vm289_vm1, %v6559_v31  ;;  %5351 = vmatmul.mubr.msk.f32.vlgmr.msra.gmra.mrb[0].mxu0 %vm289_vm1, %v3154_v32  ;;  %v3596_v32 = vld [vmem:[%s5992_s11 + $0x8e] sm:$0xff] }
  0xd2   : > { %5405 = vmatpush3.msk.msra.mxu0 %vm398_vm0, %v6355_v4  ;;  %5100 = vmatprep.mubr.msk.f32.mxu1 %vm289_vm1, %v6563_v33  ;;  %v3166_v4 = vld [vmem:[%s5992_s11 + $0x8d] sm:$0xff] }
  0xd3   : > { %5353 = vmatprep.mubr.msk.f32.mxu0 %vm289_vm1, %v3155_v34  ;;  %v3598_v34 = vld [vmem:[%s5992_s11 + $0x9e] sm:$0xff] }
  0xd5   : > { %5101 = vmatmul.mubr.msk.f32.gmra.mrb[20].mxu1 %vm289_vm1, %v6574_v35  ;;  %5354 = vmatmul.mubr.msk.f32.gmra.mrb[2].mxu0 %vm289_vm1, %v3156_v36  ;;  %v3599_v36 = vld [vmem:[%s5992_s11 + $0xa6] sm:$0xff] }
  0xd6   : > { %5103 = vmatprep.mubr.msk.f32.mxu1 %vm289_vm1, %v6579_v37  ;;  %5356 = vmatprep.mubr.msk.f32.mxu0 %vm289_vm1, %v3157_v38  ;;  %v3600_v38 = vld [vmem:[%s5992_s11 + $0xae] sm:$0xff] }
  0xd9   : > { %5104 = vmatmul.mubr.msk.f32.gmra.mrb[22].mxu1 %vm289_vm1, %v6589_v39  ;;  %5357 = vmatmul.mubr.msk.f32.gmra.mrb[4].mxu0 %vm289_vm1, %v3158_v40  ;;  %v3601_v40 = vld [vmem:[%s5992_s11 + $0xb6] sm:$0xff] }
  0xda   : > { %5106 = vmatprep.mubr.msk.f32.mxu1 %vm289_vm1, %v6593_v41  ;;  %5359 = vmatprep.mubr.msk.f32.mxu0 %vm289_vm1, %v3159_v42  ;;  %v3602_v42 = vld [vmem:[%s5992_s11 + $0xbe] sm:$0xff] }
  0xdd   : > { %5107 = vmatmul.mubr.msk.f32.gmra.mrb[24].mxu1 %vm289_vm1, %v6603_v43  ;;  %5360 = vmatmul.mubr.msk.f32.gmra.mrb[6].mxu0 %vm289_vm1, %v3160_v44  ;;  %v3603_v44 = vld [vmem:[%s5992_s11 + $0xc6] sm:$0xff] }
  0xde   : > { %5109 = vmatprep.mubr.msk.f32.mxu1 %vm289_vm1, %v6607_v45  ;;  %5362 = vmatprep.mubr.msk.f32.mxu0 %vm289_vm1, %v3161_v46  ;;  %v3604_v46 = vld [vmem:[%s5992_s11 + $0xce] sm:$0xff] }
  0xe1   : > { %5110 = vmatmul.mubr.msk.f32.gmra.mrb[26].mxu1 %vm289_vm1, %v6617_v49  ;;  %5363 = vmatmul.mubr.msk.f32.gmra.mrb[8].mxu0 %vm289_vm1, %v3162_v51  ;;  %v3605_v51 = vld [vmem:[%s5992_s11 + $0xd6] sm:$0xff] }
  0xe2   : > { %5112 = vmatprep.mubr.msk.f32.mxu1 %vm289_vm1, %v6621_v53  ;;  %5365 = vmatprep.mubr.msk.f32.mxu0 %vm289_vm1, %v3163_v55  ;;  %v3606_v55 = vld [vmem:[%s5992_s11 + $0xde] sm:$0xff] }
  0xe5   : > { %5113 = vmatmul.mubr.msk.f32.gmra.mrb[28].mxu1 %vm289_vm1, %v6631_v57  ;;  %5366 = vmatmul.mubr.msk.f32.gmra.mrb[10].mxu0 %vm289_vm1, %v3164_v59  ;;  %v3607_v59 = vld [vmem:[%s5992_s11 + $0xe6] sm:$0xff] }
  0xe6   : > { %5115 = vmatprep.mubr.msk.f32.mxu1 %vm289_vm1, %v6635_v61  ;;  %5368 = vmatprep.mubr.msk.f32.mxu0 %vm289_vm1, %v3165_v63  ;;  %v3608_v63 = vld [vmem:[%s5992_s11 + $0xee] sm:$0xff] }
  0xe9   : > { %5116 = vmatmul.mubr.msk.f32.gmra.mrb[30].mxu1 %vm289_vm1, %v6645_v2  ;;  %5369 = vmatmul.mubr.msk.f32.gmra.mrb[12].mxu0 %vm289_vm1, %v3166_v4  ;;  %v3609_v4 = vld [vmem:[%s5992_s11 + $0xf6] sm:$0xff] }
  0xea   : > { %5118 = vmatprep.mubr.msk.f32.mxu1 %vm289_vm1, %v6649_v47  ;;  %5371 = vmatprep.mubr.msk.f32.mxu0 %vm289_vm1, %v3167_v6  ;;  %v3610_v6 = vld [vmem:[%s5992_s11 + $0xfe] sm:$0xff] }
  0xed   : > { %5119 = vmatmul.mubr.msk.f32.gmra.mrb[32].mxu1 %vm289_vm1, %v6659_v48  ;;  %5372 = vmatmul.mubr.msk.f32.gmra.mrb[14].mxu0 %vm289_vm1, %v3168_v50  ;;  %v3611_v50 = vld [vmem:[%s5992_s11 + $0x106] sm:$0xff] }
  0xee   : > { %5121 = vmatprep.mubr.msk.f32.mxu1 %vm289_vm1, %v6663_v52  ;;  %5374 = vmatprep.mubr.msk.f32.mxu0 %vm289_vm1, %v3169_v54  ;;  %v3612_v54 = vld [vmem:[%s5992_s11 + $0x10e] sm:$0xff] }
  0xf1   : > { %5122 = vmatmul.mubr.msk.f32.gmra.mrb[34].mxu1 %vm289_vm1, %v6673_v56  ;;  %5375 = vmatmul.mubr.msk.f32.gmra.mrb[16].mxu0 %vm289_vm1, %v3170_v58  ;;  %v3613_v58 = vld [vmem:[%s5992_s11 + $0x116] sm:$0xff] }
  0xf2   : > { %5126 = vmatprep.mubr.msk.f32.mxu1 %vm289_vm1, %v6433_v12  ;;  %5377 = vmatprep.mubr.msk.f32.mxu0 %vm289_vm1, %v3171_v60  ;;  %v3181_v12 = vld [vmem:[%s5992_s11 + $0x105] sm:$0xff] }
  0xf3   : > { %v1894_v60 = vld [vmem:[%s5992_s11 + $0x10b] sm:$0xff] }
  0xf5   : > { %5127 = vmatmul.mubr.msk.f32.vlgmr.msra.gmra.mrb[0].mxu1 %vm289_vm1, %v6443_v13  ;;  %5378 = vmatmul.mubr.msk.f32.gmra.mrb[18].mxu0 %vm289_vm1, %v3172_v62  ;;  %v3182_v13 = vld [vmem:[%s5992_s11 + $0x10d] sm:$0xff]  ;;  %v3614_v62 = vld [vmem:[%s5992_s11 + $0x11e] sm:$0xff] }
  0xf6   : > { %5461 = vmatpush3.msk.msra.mxu1 %vm398_vm0, %v5971_v1  ;;  %5129 = vmatprep.mubr.msk.f32.mxu1 %vm289_vm1, %v6448_v14  ;;  %v3176_v1 = vld [vmem:[%s5992_s11 + $0xdd] sm:$0xff]  ;;  %v3183_v14 = vld [vmem:[%s5992_s11 + $0x115] sm:$0xff] }
  0xf7   : > { %5380 = vmatprep.mubr.msk.f32.mxu0 %vm289_vm1, %v3173_v0  ;;  %v1895_v0 = vld [vmem:[%s5992_s11 + $0x113] sm:$0xff] }
  0xf9   : > { %5130 = vmatmul.mubr.msk.f32.gmra.mrb[2].mxu1 %vm289_vm1, %v6461_v15  ;;  %5381 = vmatmul.mubr.msk.f32.gmra.mrb[20].mxu0 %vm289_vm1, %v3174_v3  ;;  %v3184_v15 = vld [vmem:[%s5992_s11 + $0x11d] sm:$0xff]  ;;  %v3615_v3 = vld [vmem:[%s5992_s11 + $0x126] sm:$0xff] }
  0xfa   : > { %5132 = vmatprep.mubr.msk.f32.mxu1 %vm289_vm1, %v6464_v16  ;;  %5383 = vmatprep.mubr.msk.f32.mxu0 %vm289_vm1, %v3175_v5  ;;  %v3185_v16 = vld [vmem:[%s5992_s11 + $0x125] sm:$0xff]  ;;  %v1896_v5 = vld [vmem:[%s5992_s11 + $0x11b] sm:$0xff] }
  0xfd   : > { %5133 = vmatmul.mubr.msk.f32.gmra.mrb[4].mxu1 %vm289_vm1, %v6475_v17  ;;  %5384 = vmatmul.mubr.msk.f32.gmra.mrb[22].mxu0 %vm289_vm1, %v3176_v1  ;;  %v3186_v17 = vld [vmem:[%s5992_s11 + $0x12d] sm:$0xff] }
  0xfe   : > { %5135 = vmatprep.mubr.msk.f32.mxu1 %vm289_vm1, %v6478_v18  ;;  %5386 = vmatprep.mubr.msk.f32.mxu0 %vm289_vm1, %v3177_v7  ;;  %v3187_v18 = vld [vmem:[%s5992_s11 + $0x135] sm:$0xff]  ;;  %v1897_v7 = vld [vmem:[%s5992_s11 + $0x123] sm:$0xff] }
  0xff   : > { %v3616_v1 = vld [vmem:[%s5992_s11 + $0x12e] sm:$0xff] }
 0x101   : > { %5136 = vmatmul.mubr.msk.f32.gmra.mrb[6].mxu1 %vm289_vm1, %v6489_v19  ;;  %5387 = vmatmul.mubr.msk.f32.gmra.mrb[24].mxu0 %vm289_vm1, %v3178_v8  ;;  %v3188_v19 = vld [vmem:[%s5992_s11 + $0x13d] sm:$0xff] }
 0x102   : > { %5138 = vmatprep.mubr.msk.f32.mxu1 %vm289_vm1, %v6492_v20  ;;  %5389 = vmatprep.mubr.msk.f32.mxu0 %vm289_vm1, %v3179_v9  ;;  %v3583_v20 = vld [vmem:[%s5992_s11 + $0x26] sm:$0xff]  ;;  %v3617_v8 = vld [vmem:[%s5992_s11 + $0x136] sm:$0xff] }
 0x103   : > { %v1898_v9 = vld [vmem:[%s5992_s11 + $0x12b] sm:$0xff] }
 0x105   : > { %5139 = vmatmul.mubr.msk.f32.gmra.mrb[8].mxu1 %vm289_vm1, %v6503_v21  ;;  %5390 = vmatmul.mubr.msk.f32.gmra.mrb[26].mxu0 %vm289_vm1, %v3180_v10  ;;  %v3584_v21 = vld [vmem:[%s5992_s11 + $0x2e] sm:$0xff]  ;;  %v3618_v10 = vld [vmem:[%s5992_s11 + $0x13e] sm:$0xff] }
 0x106   : > { %5141 = vmatprep.mubr.msk.f32.mxu1 %vm289_vm1, %v6506_v22  ;;  %5392 = vmatprep.mubr.msk.f32.mxu0 %vm289_vm1, %v3181_v12  ;;  %v3585_v22 = vld [vmem:[%s5992_s11 + $0x36] sm:$0xff] }
 0x109   : > { %5142 = vmatmul.mubr.msk.f32.gmra.mrb[10].mxu1 %vm289_vm1, %v6517_v23  ;;  %5393 = vmatmul.mubr.msk.f32.gmra.mrb[28].mxu0 %vm289_vm1, %v3182_v13  ;;  %v3586_v23 = vld [vmem:[%s5992_s11 + $0x3e] sm:$0xff] }
 0x10a   : > { %5144 = vmatprep.mubr.msk.f32.mxu1 %vm289_vm1, %v6520_v24  ;;  %5395 = vmatprep.mubr.msk.f32.mxu0 %vm289_vm1, %v3183_v14  ;;  %v3587_v24 = vld [vmem:[%s5992_s11 + $0x46] sm:$0xff] }
 0x10d   : > { %5145 = vmatmul.mubr.msk.f32.gmra.mrb[12].mxu1 %vm289_vm1, %v6531_v25  ;;  %5396 = vmatmul.mubr.msk.f32.gmra.mrb[30].mxu0 %vm289_vm1, %v3184_v15  ;;  %v3588_v25 = vld [vmem:[%s5992_s11 + $0x4e] sm:$0xff] }
 0x10e   : > { %5147 = vmatprep.mubr.msk.f32.mxu1 %vm289_vm1, %v6534_v26  ;;  %5398 = vmatprep.mubr.msk.f32.mxu0 %vm289_vm1, %v3185_v16  ;;  %v3589_v26 = vld [vmem:[%s5992_s11 + $0x56] sm:$0xff] }
 0x111   : > { %5148 = vmatmul.mubr.msk.f32.gmra.mrb[14].mxu1 %vm289_vm1, %v6545_v11  ;;  %5399 = vmatmul.mubr.msk.f32.gmra.mrb[32].mxu0 %vm289_vm1, %v3186_v17  ;;  %v3591_v11 = vld [vmem:[%s5992_s11 + $0x66] sm:$0xff] }
 0x112   : > { %5150 = vmatprep.mubr.msk.f32.mxu1 %vm289_vm1, %v6549_v29  ;;  %5401 = vmatprep.mubr.msk.f32.mxu0 %vm289_vm1, %v3187_v18  ;;  %v3593_v29 = vld [vmem:[%s5992_s11 + $0x76] sm:$0xff] }
 0x115   : > { %5151 = vmatmul.mubr.msk.f32.gmra.mrb[16].mxu1 %vm289_vm1, %v6559_v31  ;;  %5402 = vmatmul.mubr.msk.f32.gmra.mrb[34].mxu0 %vm289_vm1, %v3188_v19  ;;  %v3595_v31 = vld [vmem:[%s5992_s11 + $0x86] sm:$0xff] }
 0x116   : > { %5153 = vmatprep.mubr.msk.f32.mxu1 %vm289_vm1, %v6563_v33  ;;  %5406 = vmatprep.mubr.msk.f32.mxu0 %vm289_vm1, %v3583_v20  ;;  %v3597_v33 = vld [vmem:[%s5992_s11 + $0x96] sm:$0xff] }
 0x119   : > { %5154 = vmatmul.mubr.msk.f32.gmra.mrb[18].mxu1 %vm289_vm1, %v6574_v35  ;;  %5407 = vmatmul.mubr.msk.f32.vlgmr.msra.gmra.mrb[0].mxu0 %vm289_vm1, %v3584_v21  ;;  %v1467_v35 = vld [vmem:[%s5992_s11 + $0x122] sm:$0xff] }
 0x11a   : > { %5156 = vmatprep.mubr.msk.f32.mxu1 %vm289_vm1, %v6579_v37  ;;  %5409 = vmatprep.mubr.msk.f32.mxu0 %vm289_vm1, %v3585_v22  ;;  %v1468_v37 = vld [vmem:[%s5992_s11 + $0x12a] sm:$0xff] }
 0x11d   : > { %5157 = vmatmul.mubr.msk.f32.gmra.mrb[20].mxu1 %vm289_vm1, %v6589_v39  ;;  %5410 = vmatmul.mubr.msk.f32.gmra.mrb[2].mxu0 %vm289_vm1, %v3586_v23  ;;  %v1881_v39 = vld [vmem:[%s5992_s11 + $0xa3] sm:$0xff] }
 0x11e   : > { %5159 = vmatprep.mubr.msk.f32.mxu1 %vm289_vm1, %v6593_v41  ;;  %5412 = vmatprep.mubr.msk.f32.mxu0 %vm289_vm1, %v3587_v24  ;;  %v1882_v41 = vld [vmem:[%s5992_s11 + $0xab] sm:$0xff] }
 0x121   : > { %5160 = vmatmul.mubr.msk.f32.gmra.mrb[22].mxu1 %vm289_vm1, %v6603_v43  ;;  %5413 = vmatmul.mubr.msk.f32.gmra.mrb[4].mxu0 %vm289_vm1, %v3588_v25  ;;  %v1883_v43 = vld [vmem:[%s5992_s11 + $0xb3] sm:$0xff] }
 0x122   : > { %5162 = vmatprep.mubr.msk.f32.mxu1 %vm289_vm1, %v6607_v45  ;;  %5415 = vmatprep.mubr.msk.f32.mxu0 %vm289_vm1, %v3589_v26  ;;  %v1884_v45 = vld [vmem:[%s5992_s11 + $0xbb] sm:$0xff] }
 0x125   : > { %5163 = vmatmul.mubr.msk.f32.gmra.mrb[24].mxu1 %vm289_vm1, %v6617_v49  ;;  %5416 = vmatmul.mubr.msk.f32.gmra.mrb[6].mxu0 %vm289_vm1, %v3590_v27  ;;  %v1885_v49 = vld [vmem:[%s5992_s11 + $0xc3] sm:$0xff] }
 0x126   : > { %5165 = vmatprep.mubr.msk.f32.mxu1 %vm289_vm1, %v6621_v53  ;;  %5418 = vmatprep.mubr.msk.f32.mxu0 %vm289_vm1, %v3591_v11  ;;  %v1886_v53 = vld [vmem:[%s5992_s11 + $0xcb] sm:$0xff] }
 0x129   : > { %5166 = vmatmul.mubr.msk.f32.gmra.mrb[26].mxu1 %vm289_vm1, %v6631_v57  ;;  %5419 = vmatmul.mubr.msk.f32.gmra.mrb[8].mxu0 %vm289_vm1, %v3592_v28  ;;  %v1887_v57 = vld [vmem:[%s5992_s11 + $0xd3] sm:$0xff] }
 0x12a   : > { %5168 = vmatprep.mubr.msk.f32.mxu1 %vm289_vm1, %v6635_v61  ;;  %5421 = vmatprep.mubr.msk.f32.mxu0 %vm289_vm1, %v3593_v29  ;;  %v1888_v61 = vld [vmem:[%s5992_s11 + $0xdb] sm:$0xff] }
 0x12d   : > { %5169 = vmatmul.mubr.msk.f32.gmra.mrb[28].mxu1 %vm289_vm1, %v6645_v2  ;;  %5422 = vmatmul.mubr.msk.f32.gmra.mrb[10].mxu0 %vm289_vm1, %v3594_v30  ;;  %v1889_v2 = vld [vmem:[%s5992_s11 + $0xe3] sm:$0xff] }
 0x12e   : > { %5171 = vmatprep.mubr.msk.f32.mxu1 %vm289_vm1, %v6649_v47  ;;  %5424 = vmatprep.mubr.msk.f32.mxu0 %vm289_vm1, %v3595_v31  ;;  %v1890_v47 = vld [vmem:[%s5992_s11 + $0xeb] sm:$0xff] }
 0x131   : > { %5172 = vmatmul.mubr.msk.f32.gmra.mrb[30].mxu1 %vm289_vm1, %v6659_v48  ;;  %5425 = vmatmul.mubr.msk.f32.gmra.mrb[12].mxu0 %vm289_vm1, %v3596_v32  ;;  %v1891_v48 = vld [vmem:[%s5992_s11 + $0xf3] sm:$0xff]  ;;  %v6900_v32 = vld [vmem:[%s7001_s2] ss:$0 sm:$0xff] }
 0x132   : > { %5174 = vmatprep.mubr.msk.f32.mxu1 %vm289_vm1, %v6663_v52  ;;  %5427 = vmatprep.mubr.msk.f32.mxu0 %vm289_vm1, %v3597_v33  ;;  %v1892_v52 = vld [vmem:[%s5992_s11 + $0xfb] sm:$0xff] }
 0x135   : > { %5175 = vmatmul.mubr.msk.f32.gmra.mrb[32].mxu1 %vm289_vm1, %v6673_v56  ;;  %5428 = vmatmul.mubr.msk.f32.gmra.mrb[14].mxu0 %vm289_vm1, %v3598_v34  ;;  %v1893_v56 = vld [vmem:[%s5992_s11 + $0x103] sm:$0xff]  ;;  %s4173_s11 = sshll.u32 %s201_s9, 4  ;;  %s6954_s11 = int_to_ptr.vmem [resolvable:$true] %s4173_s11 }
 0x136   : > { %5177 = vmatprep.mubr.msk.f32.mxu1 %vm289_vm1, %v1467_v35  ;;  %5430 = vmatprep.mubr.msk.f32.mxu0 %vm289_vm1, %v3599_v36  ;;  %s5809_s26 = scalar_lea.vmem %s6954_s11, 384  ;;  %p5816_p1 = scmp.lt.s32.totalorder %s6954_s11, %s5814_s27 }
 0x137   : > { %p5810_p12 = scmp.ne.s32.totalorder %s6954_s11, %s5809_s26  ;;  %p5817_p2 = scmp.lt.s32.totalorder %s5815_s28, %s5809_s26 }
 0x139   : > { %5178 = vmatmul.mubr.msk.f32.gmra.mrb[34].mxu1 %vm289_vm1, %v1468_v37  ;;  %5431 = vmatmul.mubr.msk.f32.gmra.mrb[16].mxu0 %vm289_vm1, %v3600_v38  ;;  %p5811_p13 = pnand %p5810_p12, %p5950_p4  ;;  %p5818_p3 = por %p5817_p2, %p5816_p1 }
 0x13a   : > { %5209 = vmatprep.mubr.msk.f32.mxu1 %vm289_vm1, %v1881_v39  ;;  %5433 = vmatprep.mubr.msk.f32.mxu0 %vm289_vm1, %v3601_v40 }
 0x13b   : > { %p5812_p0 = pneg %p5811_p13 }
 0x13d   : > { %5210 = vmatmul.mubr.msk.f32.vlgmr.msra.gmra.mrb[18].mxu1 %vm289_vm1, %v1882_v41  ;;  %5434 = vmatmul.mubr.msk.f32.gmra.mrb[18].mxu0 %vm289_vm1, %v3602_v42  ;;  %p5819_p5 = pnand %p5818_p3, %p5812_p0 }
 0x13e   : > { %5212 = vmatprep.mubr.msk.f32.mxu1 %vm289_vm1, %v1883_v43  ;;  %5436 = vmatprep.mubr.msk.f32.mxu0 %vm289_vm1, %v3603_v44 }
 0x141   : > { %5213 = vmatmul.mubr.msk.f32.gmra.mrb[20].mxu1 %vm289_vm1, %v1884_v45  ;;  %5437 = vmatmul.mubr.msk.f32.gmra.mrb[20].mxu0 %vm289_vm1, %v3604_v46 }
 0x142   : > { %5215 = vmatprep.mubr.msk.f32.mxu1 %vm289_vm1, %v1885_v49  ;;  %5439 = vmatprep.mubr.msk.f32.mxu0 %vm289_vm1, %v3605_v51 }
 0x145   : > { %5216 = vmatmul.mubr.msk.f32.gmra.mrb[22].mxu1 %vm289_vm1, %v1886_v53  ;;  %5440 = vmatmul.mubr.msk.f32.gmra.mrb[22].mxu0 %vm289_vm1, %v3606_v55 }
 0x146   : > { %5218 = vmatprep.mubr.msk.f32.mxu1 %vm289_vm1, %v1887_v57  ;;  %5442 = vmatprep.mubr.msk.f32.mxu0 %vm289_vm1, %v3607_v59 }
 0x149   : > { %5219 = vmatmul.mubr.msk.f32.gmra.mrb[24].mxu1 %vm289_vm1, %v1888_v61  ;;  %5443 = vmatmul.mubr.msk.f32.gmra.mrb[24].mxu0 %vm289_vm1, %v3608_v63 }
 0x14a   : > { %5221 = vmatprep.mubr.msk.f32.mxu1 %vm289_vm1, %v1889_v2  ;;  %5445 = vmatprep.mubr.msk.f32.mxu0 %vm289_vm1, %v3609_v4 }
 0x14d   : > { %5222 = vmatmul.mubr.msk.f32.gmra.mrb[26].mxu1 %vm289_vm1, %v1890_v47  ;;  %5446 = vmatmul.mubr.msk.f32.gmra.mrb[26].mxu0 %vm289_vm1, %v3610_v6 }
 0x14e   : > { %5224 = vmatprep.mubr.msk.f32.mxu1 %vm289_vm1, %v1891_v48  ;;  %5448 = vmatprep.mubr.msk.f32.mxu0 %vm289_vm1, %v3611_v50 }
 0x151   : > { %5225 = vmatmul.mubr.msk.f32.gmra.mrb[28].mxu1 %vm289_vm1, %v1892_v52  ;;  %5449 = vmatmul.mubr.msk.f32.gmra.mrb[28].mxu0 %vm289_vm1, %v3612_v54 }
 0x152   : > { %5227 = vmatprep.mubr.msk.f32.mxu1 %vm289_vm1, %v1893_v56  ;;  %5451 = vmatprep.mubr.msk.f32.mxu0 %vm289_vm1, %v3613_v58 }
 0x155   : > { %5228 = vmatmul.mubr.msk.f32.gmra.mrb[30].mxu1 %vm289_vm1, %v1894_v60  ;;  %5452 = vmatmul.mubr.msk.f32.gmra.mrb[30].mxu0 %vm289_vm1, %v3614_v62 }
 0x156   : > { %5230 = vmatprep.mubr.msk.f32.mxu1 %vm289_vm1, %v1895_v0  ;;  %5454 = vmatprep.mubr.msk.f32.mxu0 %vm289_vm1, %v3615_v3 }
 0x159   : > { %5231 = vmatmul.mubr.msk.f32.gmra.mrb[32].mxu1 %vm289_vm1, %v1896_v5  ;;  %5455 = vmatmul.mubr.msk.f32.gmra.mrb[32].mxu0 %vm289_vm1, %v3616_v1 }
 0x15a   : > { %5233 = vmatprep.mubr.msk.f32.mxu1 %vm289_vm1, %v1897_v7  ;;  %5457 = vmatprep.mubr.msk.f32.mxu0 %vm289_vm1, %v3617_v8 }
 0x15d   : > { %5234 = vmatmul.mubr.msk.f32.gmra.mrb[34].mxu1 %vm289_vm1, %v1898_v9  ;;  %5458 = vmatmul.mubr.msk.f32.gmra.mrb[34].mxu0 %vm289_vm1, %v3618_v10 }
 0x1c8   : > { %v5128_v12 = vpop.f32.mrb[0].mxu1 }
 0x1c9   : > { %v1648_v13 = vpop.f32.mrb[1].mxu1 }
 0x1cc   : > { %v5131_v14 = vpop.f32.mrb[2].mxu1 }
 0x1cd   : > { %v1658_v15 = vpop.f32.mrb[3].mxu1 }
 0x1d0   : > { %v5134_v16 = vpop.f32.mrb[4].mxu1 }
 0x1d1   : > { %v1668_v17 = vpop.f32.mrb[5].mxu1 }
 0x1d4   : > { %v5137_v18 = vpop.f32.mrb[6].mxu1 }
 0x1d5   : > { %v1678_v19 = vpop.f32.mrb[7].mxu1 }
 0x1d8   : > { %v5140_v20 = vpop.f32.mrb[8].mxu1 }
 0x1d9   : > { %v1688_v21 = vpop.f32.mrb[9].mxu1 }
 0x1dc   : > { %v5143_v22 = vpop.f32.mrb[10].mxu1 }
 0x1dd   : > { %v1698_v23 = vpop.f32.mrb[11].mxu1 }
 0x1e0   : > { %v5146_v24 = vpop.f32.mrb[12].mxu1 }
 0x1e1   : > { %v1708_v25 = vpop.f32.mrb[13].mxu1 }
 0x1e4   : > { %v5149_v26 = vpop.f32.mrb[14].mxu1 }
 0x1e5   : > { %v1718_v27 = vpop.f32.mrb[15].mxu1 }
 0x1e8   : > { %v5152_v11 = vpop.f32.mrb[16].mxu1 }
 0x1e9   : > { %v1728_v28 = vpop.f32.mrb[17].mxu1 }
 0x1ec   : > { %v5408_v29 = vpop.f32.mrb[0].mxu0 }
 0x1ed   : > { %v5462_v30 = vadd.f32 %v5408_v29, %v5128_v12  ;;  %v3798_v31 = vpop.f32.mrb[1].mxu0 }
 0x1ee   : > { %v5463_v33 = vadd.f32 %v3798_v31, %v1648_v13 }
 0x1ef   : > { %v4021_v40 = vadd.f32 %v5462_v30, %v6900_v32 }
 0x1f0   : > { %v5411_v34 = vpop.f32.mrb[2].mxu0  ;;  %v4020_v35 = vadd.f32 %v5463_v33, %v6900_v32 }
 0x1f1   : > { %v5464_v36 = vadd.f32 %v5411_v34, %v5131_v14  ;;  %v3808_v37 = vpop.f32.mrb[3].mxu0 }
 0x1f2   : > { %v5465_v38 = vadd.f32 %v3808_v37, %v1658_v15  ;;  %4056 = vxpose.xlu0.b32.start [1/16] (narrow) %v4020_v35, 8 }
 0x1f3   : > { %v4023_v55 = vadd.f32 %v5464_v36, %v6900_v32 }
 0x1f4   : > { %v5414_v39 = vpop.f32.mrb[4].mxu0  ;;  %v4022_v45 = vadd.f32 %v5465_v38, %v6900_v32 }
 0x1f5   : > { %v5466_v41 = vadd.f32 %v5414_v39, %v5134_v16  ;;  %v3818_v42 = vpop.f32.mrb[5].mxu0 }
 0x1f6   : > { %v5467_v43 = vadd.f32 %v3818_v42, %v1668_v17  ;;  %4057 = vxpose.xlu0.b32.cont [2/16] (narrow) %v4021_v40, 8 }
 0x1f7   : > { %v4025_v50 = vadd.f32 %v5466_v41, %v6900_v32 }
 0x1f8   : > { %v5417_v44 = vpop.f32.mrb[6].mxu0  ;;  %v4024_v2 = vadd.f32 %v5467_v43, %v6900_v32 }
 0x1f9   : > { %v5468_v46 = vadd.f32 %v5417_v44, %v5137_v18  ;;  %v3828_v49 = vpop.f32.mrb[7].mxu0 }
 0x1fa   : > { %v5469_v51 = vadd.f32 %v3828_v49, %v1678_v19  ;;  %4058 = vxpose.xlu0.b32.cont [3/16] (narrow) %v4022_v45, 8 }
 0x1fb   : > { %v4027_v1 = vadd.f32 %v5468_v46, %v6900_v32 }
 0x1fc   : > { %v5420_v53 = vpop.f32.mrb[8].mxu0  ;;  %v4026_v60 = vadd.f32 %v5469_v51, %v6900_v32 }
 0x1fd   : > { %v5470_v57 = vadd.f32 %v5420_v53, %v5140_v20  ;;  %v3838_v59 = vpop.f32.mrb[9].mxu0 }
 0x1fe   : > { %v5471_v61 = vadd.f32 %v3838_v59, %v1688_v21  ;;  %4059 = vxpose.xlu0.b32.cont [4/16] (narrow) %v4023_v55, 8 }
 0x1ff   : > { %v4029_v21 = vadd.f32 %v5470_v57, %v6900_v32 }
 0x200   : > { %v5423_v63 = vpop.f32.mrb[10].mxu0  ;;  %v4028_v13 = vadd.f32 %v5471_v61, %v6900_v32 }
 0x201   : > { %v5472_v4 = vadd.f32 %v5423_v63, %v5143_v22  ;;  %v3848_v47 = vpop.f32.mrb[11].mxu0 }
 0x202   : > { %v5473_v6 = vadd.f32 %v3848_v47, %v1698_v23  ;;  %4060 = vxpose.xlu0.b32.cont [5/16] (narrow) %v4024_v2, 8 }
 0x203   : > { %v4031_v37 = vadd.f32 %v5472_v4, %v6900_v32 }
 0x204   : > { %v5426_v48 = vpop.f32.mrb[12].mxu0 }
 0x205   : > { %v6908_v52 = vadd.f32 %v5426_v48, %v5146_v24  ;;  %v3858_v54 = vpop.f32.mrb[13].mxu0 }
 0x206   : > { %v5475_v56 = vadd.f32 %v3858_v54, %v1708_v25  ;;  %4061 = vxpose.xlu0.b32.cont [6/16] (narrow) %v4025_v50, 8 }
 0x207   : > { %v4033_v61 = vadd.f32 %v6908_v52, %v6900_v32 }
 0x208   : > { %v5429_v58 = vpop.f32.mrb[14].mxu0  ;;  %v4032_v45 = vadd.f32 %v5475_v56, %v6900_v32 }
 0x209   : > { %v6911_v62 = vadd.f32 %v5429_v58, %v5149_v26  ;;  %v3868_v0 = vpop.f32.mrb[15].mxu0 }
 0x20a   : > { %v6913_v3 = vadd.f32 %v3868_v0, %v1718_v27  ;;  %4062 = vxpose.xlu0.b32.cont [7/16] (narrow) %v4026_v60, 8 }
 0x20c   : > { %v5432_v5 = vpop.f32.mrb[16].mxu0  ;;  %v4034_v54 = vadd.f32 %v6913_v3, %v6900_v32 }
 0x20d   : > { %v5478_v7 = vadd.f32 %v5432_v5, %v5152_v11  ;;  %v3878_v8 = vpop.f32.mrb[17].mxu0 }
 0x20e   : > { %v5479_v9 = vadd.f32 %v3878_v8, %v1728_v28  ;;  %4063 = vxpose.xlu0.b32.cont [8/16] (narrow) %v4027_v1, 8  ;;  %v4030_v28 = vadd.f32 %v5473_v6, %v6900_v32 }
 0x20f   : > { %v4037_v22 = vadd.f32 %v5478_v7, %v6900_v32  ;;  %v4035_v7 = vadd.f32 %v6911_v62, %v6900_v32 }
 0x210   : > { %v5211_v10 = vpop.f32.mrb[18].mxu1  ;;  %v5435_v12 = vpop.f32.mrb[18].mxu0  ;;  %v4036_v14 = vadd.f32 %v5479_v9, %v6900_v32 }
 0x211   : > { %v5480_v15 = vadd.f32 %v5435_v12, %v5211_v10  ;;  %v2168_v16 = vpop.f32.mrb[19].mxu1  ;;  %v3888_v17 = vpop.f32.mrb[19].mxu0 }
 0x212   : > { %v5481_v18 = vadd.f32 %v3888_v17, %v2168_v16  ;;  %4064 = vxpose.xlu0.b32.cont [9/16] (narrow) %v4028_v13, 8  ;;  %4088 = vxpose.xlu1.b32.start [1/16] (narrow) %v4036_v14, 8 }
 0x213   : > { %v4039_v38 = vadd.f32 %v5480_v15, %v6900_v32 }
 0x214   : > { %v5214_v19 = vpop.f32.mrb[20].mxu1  ;;  %v5438_v20 = vpop.f32.mrb[20].mxu0  ;;  %v4038_v29 = vadd.f32 %v5481_v18, %v6900_v32 }
 0x215   : > { %v5482_v23 = vadd.f32 %v5438_v20, %v5214_v19  ;;  %v2178_v24 = vpop.f32.mrb[21].mxu1  ;;  %v3898_v25 = vpop.f32.mrb[21].mxu0 }
 0x216   : > { %v5483_v26 = vadd.f32 %v3898_v25, %v2178_v24  ;;  %4065 = vxpose.xlu0.b32.cont [10/16] (narrow) %v4029_v21, 8  ;;  %4089 = vxpose.xlu1.b32.cont [2/16] (narrow) %v4037_v22, 8 }
 0x217   : > { %v4041_v63 = vadd.f32 %v5482_v23, %v6900_v32 }
 0x218   : > { %v5217_v27 = vpop.f32.mrb[22].mxu1  ;;  %v5441_v11 = vpop.f32.mrb[22].mxu0  ;;  %v4040_v46 = vadd.f32 %v5483_v26, %v6900_v32 }
 0x219   : > { %v5484_v30 = vadd.f32 %v5441_v11, %v5217_v27  ;;  %v2188_v31 = vpop.f32.mrb[23].mxu1  ;;  %v3908_v33 = vpop.f32.mrb[23].mxu0 }
 0x21a   : > { %v5485_v34 = vadd.f32 %v3908_v33, %v2188_v31  ;;  %4066 = vxpose.xlu0.b32.cont [11/16] (narrow) %v4030_v28, 8  ;;  %4090 = vxpose.xlu1.b32.cont [3/16] (narrow) %v4038_v29, 8 }
 0x21b   : > { %v4043_v8 = vadd.f32 %v5484_v30, %v6900_v32 }
 0x21c   : > { %v5220_v35 = vpop.f32.mrb[24].mxu1  ;;  %v5444_v36 = vpop.f32.mrb[24].mxu0  ;;  %v4042_v56 = vadd.f32 %v5485_v34, %v6900_v32 }
 0x21d   : > { %v5486_v39 = vadd.f32 %v5444_v36, %v5220_v35  ;;  %v2198_v40 = vpop.f32.mrb[25].mxu1  ;;  %v3918_v41 = vpop.f32.mrb[25].mxu0 }
 0x21e   : > { %v5487_v42 = vadd.f32 %v3918_v41, %v2198_v40  ;;  %4067 = vxpose.xlu0.b32.cont [12/16] (narrow) %v4031_v37, 8  ;;  %4091 = vxpose.xlu1.b32.cont [4/16] (narrow) %v4039_v38, 8 }
 0x21f   : > { %v4045_v21 = vadd.f32 %v5486_v39, %v6900_v32 }
 0x220   : > { %v5223_v43 = vpop.f32.mrb[26].mxu1  ;;  %v5447_v44 = vpop.f32.mrb[26].mxu0  ;;  %v4044_v15 = vadd.f32 %v5487_v42, %v6900_v32 }
 0x221   : > { %v5488_v49 = vadd.f32 %v5447_v44, %v5223_v43  ;;  %v2208_v51 = vpop.f32.mrb[27].mxu1  ;;  %v3928_v53 = vpop.f32.mrb[27].mxu0 }
 0x222   : > { %v5489_v55 = vadd.f32 %v3928_v53, %v2208_v51  ;;  %4068 = vxpose.xlu0.b32.cont [13/16] (narrow) %v4032_v45, 8  ;;  %4092 = vxpose.xlu1.b32.cont [5/16] (narrow) %v4040_v46, 8 }
 0x223   : > { %v4047_v25 = vadd.f32 %v5488_v49, %v6900_v32 }
 0x224   : > { %v5226_v57 = vpop.f32.mrb[28].mxu1  ;;  %v5450_v59 = vpop.f32.mrb[28].mxu0  ;;  %v4046_v23 = vadd.f32 %v5489_v55, %v6900_v32 }
 0x225   : > { %v5490_v2 = vadd.f32 %v5450_v59, %v5226_v57  ;;  %v2218_v4 = vpop.f32.mrb[29].mxu1  ;;  %v3938_v47 = vpop.f32.mrb[29].mxu0 }
 0x226   : > { %v5491_v6 = vadd.f32 %v3938_v47, %v2218_v4  ;;  %4069 = vxpose.xlu0.b32.cont [14/16] (narrow) %v4033_v61, 8  ;;  %4093 = vxpose.xlu1.b32.cont [6/16] (narrow) %v4041_v63, 8 }
 0x227   : > { %v4049_v27 = vadd.f32 %v5490_v2, %v6900_v32 }
 0x228   : > { %v5229_v48 = vpop.f32.mrb[30].mxu1  ;;  %v5453_v50 = vpop.f32.mrb[30].mxu0  ;;  %v4048_v26 = vadd.f32 %v5491_v6, %v6900_v32 }
 0x229   : > { %v5492_v58 = vadd.f32 %v5453_v50, %v5229_v48  ;;  %v2228_v60 = vpop.f32.mrb[31].mxu1  ;;  %v3948_v0 = vpop.f32.mrb[31].mxu0 }
 0x22a   : > { %v5493_v5 = vadd.f32 %v3948_v0, %v2228_v60  ;;  %4070 = vxpose.xlu0.b32.cont [15/16] (narrow) %v4034_v54, 8  ;;  %4094 = vxpose.xlu1.b32.cont [7/16] (narrow) %v4042_v56, 8 }
 0x22b   : > { %v4051_v28 = vadd.f32 %v5492_v58, %v6900_v32 }
 0x22c   : > { %v5232_v52 = vpop.f32.mrb[32].mxu1  ;;  %v5456_v1 = vpop.f32.mrb[32].mxu0  ;;  %v4050_v11 = vadd.f32 %v5493_v5, %v6900_v32 }
 0x22d   : > { %v5494_v9 = vadd.f32 %v5456_v1, %v5232_v52  ;;  %v2238_v10 = vpop.f32.mrb[33].mxu1  ;;  %v3958_v12 = vpop.f32.mrb[33].mxu0 }
 0x22e   : > { %v5495_v13 = vadd.f32 %v3958_v12, %v2238_v10  ;;  %4071 = vxpose.xlu0.b32.end [16/16] (narrow) %v4035_v7, 8  ;;  %4095 = vxpose.xlu1.b32.cont [8/16] (narrow) %v4043_v8, 8 }
 0x22f   : > { %v4053_v62 = vadd.f32 %v5494_v9, %v6900_v32 }
 0x230   : > { %v5235_v3 = vpop.f32.mrb[34].mxu1  ;;  %v5459_v14 = vpop.f32.mrb[34].mxu0  ;;  %v4052_v16 = vadd.f32 %v5495_v13, %v6900_v32 }
 0x231   : > { %v5496_v17 = vadd.f32 %v5459_v14, %v5235_v3  ;;  %v2248_v18 = vpop.f32.mrb[35].mxu1  ;;  %v3968_v19 = vpop.f32.mrb[35].mxu0 }
 0x232   : > { %v5497_v20 = vadd.f32 %v3968_v19, %v2248_v18  ;;  %4096 = vxpose.xlu1.b32.cont [9/16] (narrow) %v4044_v15, 8  ;;  %4120 = vxpose.xlu0.b32.start [1/4] (short) (narrow) %v4052_v16, 8 }
 0x233   : > { %v4055_v24 = vadd.f32 %v5496_v17, %v6900_v32 }
 0x234   : > { %v4054_v22 = vadd.f32 %v5497_v20, %v6900_v32 }
 0x236   : > { %4097 = vxpose.xlu1.b32.cont [10/16] (narrow) %v4045_v21, 8  ;;  %4121 = vxpose.xlu0.b32.cont [2/4] (short) (narrow) %v4053_v62, 8 }
 0x23a   : > { %4098 = vxpose.xlu1.b32.cont [11/16] (narrow) %v4046_v23, 8  ;;  %4122 = vxpose.xlu0.b32.cont [3/4] (short) (narrow) %v4054_v22, 8 }
 0x23e   : > { %4099 = vxpose.xlu1.b32.cont [12/16] (narrow) %v4047_v25, 8  ;;  %4123 = vxpose.xlu0.b32.end [4/4] (short) (narrow) %v4055_v24, 8 }
 0x242   : > { %4100 = vxpose.xlu1.b32.cont [13/16] (narrow) %v4048_v26, 8 }
 0x246   : > { %4101 = vxpose.xlu1.b32.cont [14/16] (narrow) %v4049_v27, 8 }
 0x24a   : > { %4102 = vxpose.xlu1.b32.cont [15/16] (narrow) %v4050_v11, 8 }
 0x24e   : > { %4103 = vxpose.xlu1.b32.end [16/16] (narrow) %v4051_v28, 8 }
 0x272   : > { %v4072_v29 = vpop.trf.xlu0 }
 0x273   : > { %4152 = vst [vmem:[%s201_s9] sm:$0xff] %v4072_v29 }
 0x292   : > { %v4104_v30 = vpop.trf.xlu1 }
 0x293   : > { %4153 = vst [vmem:[%s201_s9 + $0x8] sm:$0xff] %v4104_v30 }
 0x2b2   : > { %v4136_v32 = vpop.trf.xlu0 }
 0x2b3   : > { %4155 = vst.msk [vmem:[%s201_s9 + $0x10] sm:$0xff] %vm4154_vm2, %v4136_v32 }
 0x2b4   : > { %5822 = shalt.err (!%p5819_p5)
}
 0x2b5   : > { %s5823_s29 = scalar_lea.hbm %s6952_s21, 384  ;;  %s5827_s5 = scalar_lea.hbm %s7002_s3, 768 }
 0x2b6   : > { %p5824_p6 = scmp.ne.s32.totalorder %s6952_s21, %s5823_s29  ;;  %p5828_p10 = scmp.lt.u32.totalorder %s6952_s21, %s7002_s3 }
 0x2b7   : > { %p5829_p11 = scmp.lt.u32.totalorder %s5827_s5, %s5823_s29  ;;  %p5831_p13 = scmp.lt.u32.totalorder %s5823_s29, %s6952_s21 }
 0x2b8   : > { %p5825_p7 = pnand %p5824_p6, %p5950_p4 }
 0x2b9   : > { %p5830_p12 = por %p5829_p11, %p5828_p10 }
 0x2ba   : > { %p5826_p9 = pneg %p5825_p7 }
 0x2bb   : > { %p5832_p0 = por %p5831_p13, %p5830_p12 }
 0x2bd   : > { %p5833_p1 = pnand %p5832_p0, %p5826_p9 }
 0x2bf   : > { %5836 = shalt.err (!%p5833_p1)
}
 0x2c0   : > { %5753 = dma.vmem_to_hbm [thread:$0]  (%p5950_p4), %s6954_s11, 384, %s6952_s21, %s4157_s23  }
 0x2c1 PF: > { %p5759_p2 = scmp.ge.s32.totalorder %s5887_s17, 2  ;;  %s4185_s8 = sand.u32 1, %s5867_s12  }
 0x2c2   : > { %s4186_s9 = scalar_lea.sflag [#allocation3], %s4185_s8 }
 0x2c3   : > { %p5756_p3 = pnand %p5759_p2, %p5957_p8 }
 0x2c5   : > { %5862 = dma.done.wait (!%p5756_p3), %s4186_s9, 384  }
 0x2c6   : > { %5864 = vsyncadd (!%p5756_p3), %s4186_s9, 4294966912  ;;  %s16_s17 = sadd.s32 1, %s5887_s17   ;;  %s7005_s12 = smov %s5871_s13 }
 0x2c7   : > { %p13_p5 = scmp.ge.s32.totalorder %s16_s17, 4   ;;  %s7006_s13 = smov %s5875_s14 }
 0x2c8   : > { %s7007_s14 = smov %s5963_s25  ;;  %s7008_s15 = smov %s5883_s16 }
 0x2c9   : > { %s7009_s16 = smov %s7011_s20  ;;  %15 = sbr.rel (!%p13_p5) target bundleno = 4 (0x4), region = 81 }
 0x2d0   :  { %4191 = vsyncpa [#allocation3], 1 }
 0x2d1   :  { %4193 = vsyncpa [#allocation3 + $0x1], 1 }

</bundles_post_ra>
